<compile_context>
chip_gen: v7x
topology: tpu7x:2x2x1
jax: 0.10.0
libtpu: 0.0.40
codegen_flags: <defaults>
</compile_context>

<pallas_src>
import jax
import jax.numpy as jnp
from jax import lax
from jax.experimental import pallas as pl
from jax.experimental.pallas import tpu as pltpu

EPS = 1e-5


# ----------------------------------------------------------------------------
# Fused kernel: the whole ConvBlock for one batch image, entirely in VMEM.
# Activation layout inside the kernel: (H, W*C), lane index = w*C + c.
# ----------------------------------------------------------------------------
def _make_conv_block_kernel(H, W, has_down):
    def kernel(*refs):
        if has_down:
            (x_ref,
             s1, b1, m1, p1,
             s2, b2, m2, p2,
             s3, b3, m3, p3,
             sd, bd, md,
             o_ref) = refs
        else:
            (x_ref,
             s1, b1, m1, p1,
             s2, b2, m2, p2,
             s3, b3, m3, p3,
             o_ref) = refs

        f32 = jnp.float32
        bf16 = jnp.bfloat16

        # Tiny 0/1 row-shift matrices (H, H), built once per grid step.
        # (Sd @ Z)[h] = Z[h-1] with a zero row at h=0;  (Su @ Z)[h] = Z[h+1]
        # with a zero row at h=H-1.  They implement the H zero padding that
        # PyTorch applies *after* BN+ReLU, purely with MXU work.
        r = lax.broadcasted_iota(jnp.int32, (H, H), 0)
        c = lax.broadcasted_iota(jnp.int32, (H, H), 1)
        shift_dn = jnp.where(c == r - 1, 1.0, 0.0).astype(bf16)
        shift_up = jnp.where(c == r + 1, 1.0, 0.0).astype(bf16)

        def bn_relu(a, s_ref, b_ref):
            # a: (H, W*C) f32; scale/bias pre-tiled to (1, W*C) in the wrapper.
            return jnp.maximum(a * s_ref[...] + b_ref[...], 0.0)

        def conv3x3(z, m_ref):
            """z: (H, W*C) f32 post BN+ReLU.  m_ref: (3, W*C, W*D) bf16 banded
            weight matrices (one per kernel row dy).  Returns (H, W*D) f32."""
            zb = z.astype(bf16)
            # Row-shifted copies (exact: 0/1 matrix, f32 accumulation).
            z_dn = jnp.dot(shift_dn, zb, preferred_element_type=f32).astype(bf16)
            z_up = jnp.dot(shift_up, zb, preferred_element_type=f32).astype(bf16)
            acc = jnp.dot(z_dn, m_ref[0], preferred_element_type=f32)
            acc = acc + jnp.dot(zb, m_ref[1], preferred_element_type=f32)
            acc = acc + jnp.dot(z_up, m_ref[2], preferred_element_type=f32)
            return acc

        x = x_ref[0].astype(f32)                       # (H, W*Cin)

        out1 = conv3x3(bn_relu(x, s1, b1), m1)         # (H, W*C1)
        out2 = conv3x3(bn_relu(out1, s2, b2), m2)      # (H, W*C2)
        out3 = conv3x3(bn_relu(out2, s3, b3), m3)      # (H, W*C3)

        # Channel concat via exact 0/1 placement matmuls (kept in f32).
        final = jnp.dot(out1, p1[...], preferred_element_type=f32)
        final = final + jnp.dot(out2, p2[...], preferred_element_type=f32)
        final = final + jnp.dot(out3, p3[...], preferred_element_type=f32)

        # Residual path folded into the same kernel.
        if has_down:
            ad = bn_relu(x, sd, bd).astype(bf16)
            final = final + jnp.dot(ad, md[...], preferred_element_type=f32)
        else:
            final = final + x                           # Cin == Cout, same packing

        o_ref[0] = final.astype(o_ref.dtype)            # (H, W*Cout), lane-dense

    return kernel


# ----------------------------------------------------------------------------
# Wrapper-side parameter preparation (pure JAX, one-time, tiny).
# ----------------------------------------------------------------------------
def _fold_bn_tiled(bn, W):
    gamma, beta, mean, var = bn
    scale = (gamma / jnp.sqrt(var + EPS)).astype(jnp.float32)
    bias = (beta - mean * scale).astype(jnp.float32)
    C = scale.shape[0]
    s = jnp.tile(scale, W).reshape(1, W * C)
    b = jnp.tile(bias, W).reshape(1, W * C)
    return s, b


def _band_weights(w_oihw, W):
    """(D, C, 3, 3) PyTorch OIHW weights -> (3, W*C, W*D) bf16 banded matrices.

    M[dy][wi*C + ci, wo*D + co] = w[co, ci, dy, wi - wo + 1] inside the band,
    zero outside, so `z_packed @ M[dy]` performs the 3x3 conv restricted to
    kernel row dy with the W zero-padding built in.
    """
    w_hwio = jnp.transpose(w_oihw, (2, 3, 1, 0)).astype(jnp.float32)  # (3,3,C,D)
    C, D = w_hwio.shape[2], w_hwio.shape[3]
    mats = []
    for dy in range(3):
        m = jnp.zeros((W * C, W * D), jnp.float32)
        for dx in range(3):
            m = m + jnp.kron(jnp.eye(W, W, 1 - dx, dtype=jnp.float32),
                             w_hwio[dy, dx])
        mats.append(m)
    return jnp.stack(mats, axis=0).astype(jnp.bfloat16)


def _placement(Ci, Cout, offset, W):
    """0/1 matrix scattering packed (H, W*Ci) into lanes [offset, offset+Ci)
    of every pixel of the packed (H, W*Cout) output (= the channel concat)."""
    return jnp.kron(jnp.eye(W, dtype=jnp.float32),
                    jnp.eye(Ci, Cout, offset, dtype=jnp.float32))


def _down_weights(w_oihw, W):
    """(Cout, Cin, 1, 1) 1x1 conv -> block-diagonal (W*Cin, W*Cout) bf16."""
    Cout, Cin = w_oihw.shape[0], w_oihw.shape[1]
    w2 = w_oihw.reshape(Cout, Cin).T.astype(jnp.float32)   # (Cin, Cout)
    return jnp.kron(jnp.eye(W, dtype=jnp.float32), w2).astype(jnp.bfloat16)


def conv_block_forward(x_nchw, params):
    """ConvBlock.forward; input/output NCHW (PyTorch convention)."""
    N, Cin, H, W = x_nchw.shape
    C1 = params["conv1_w"].shape[0]
    C2 = params["conv2_w"].shape[0]
    C3 = params["conv3_w"].shape[0]
    Cout = C1 + C2 + C3
    has_down = params.get("down_w") is not None
    if not has_down:
        assert Cin == Cout, "identity residual requires in_planes == out_planes"

    # NCHW -> NHWC -> lane-packed (N, H, W*Cin).  The reshape is a free view.
    x = jnp.transpose(x_nchw, (0, 2, 3, 1)).astype(jnp.float32)
    x = x.reshape(N, H, W * Cin)

    s1, b1 = _fold_bn_tiled(params["bn1"], W)
    s2, b2 = _fold_bn_tiled(params["bn2"], W)
    s3, b3 = _fold_bn_tiled(params["bn3"], W)
    m1 = _band_weights(params["conv1_w"], W)
    m2 = _band_weights(params["conv2_w"], W)
    m3 = _band_weights(params["conv3_w"], W)
    p1 = _placement(C1, Cout, 0, W)
    p2 = _placement(C2, Cout, C1, W)
    p3 = _placement(C3, Cout, C1 + C2, W)

    inputs = [x, s1, b1, m1, p1, s2, b2, m2, p2, s3, b3, m3, p3]
    if has_down:
        sd, bd = _fold_bn_tiled(params["down_bn"], W)
        md = _down_weights(params["down_w"], W)
        inputs += [sd, bd, md]

    def param_spec(a):
        zeros = (0,) * a.ndim
        return pl.BlockSpec(a.shape, lambda n: zeros)

    in_specs = [pl.BlockSpec((1, H, W * Cin), lambda n: (n, 0, 0))]
    in_specs += [param_spec(a) for a in inputs[1:]]

    kernel = _make_conv_block_kernel(H, W, has_down)

    y = pl.pallas_call(
        kernel,
        out_shape=jax.ShapeDtypeStruct((N, H, W * Cout), jnp.float32),
        grid=(N,),
        in_specs=in_specs,
        out_specs=pl.BlockSpec((1, H, W * Cout), lambda n: (n, 0, 0)),
        compiler_params=pltpu.CompilerParams(
            dimension_semantics=("parallel",),
            vmem_limit_bytes=32 * 1024 * 1024),
    )(*inputs)

    # (N, H, W*Cout) -> (N, H, W, Cout) is a free view; then back to NCHW.
    return jnp.transpose(y.reshape(N, H, W, Cout), (0, 3, 1, 2))


# ----------------------------------------------------------------------------
# Pure-JAX reference (f32, HIGHEST precision) for a correctness sanity check.
# ----------------------------------------------------------------------------
def reference_forward(x_nchw, p):
    x = jnp.transpose(x_nchw, (0, 2, 3, 1))

    def bn_relu(y, bn):
        g, b, m, v = bn
        return jnp.maximum(g * (y - m) / jnp.sqrt(v + EPS) + b, 0.0)

    def conv(y, w_oihw, pad):
        w = jnp.transpose(w_oihw, (2, 3, 1, 0))
        return lax.conv_general_dilated(
            y, w, (1, 1), ((pad, pad), (pad, pad)),
            dimension_numbers=("NHWC", "HWIO", "NHWC"),
            precision=lax.Precision.HIGHEST)

    out1 = conv(bn_relu(x, p["bn1"]), p["conv1_w"], 1)
    out2 = conv(bn_relu(out1, p["bn2"]), p["conv2_w"], 1)
    out3 = conv(bn_relu(out2, p["bn3"]), p["conv3_w"], 1)
    cat = jnp.concatenate([out1, out2, out3], axis=-1)
    residual = conv(bn_relu(x, p["down_bn"]), p["down_w"], 0) \
        if p.get("down_w") is not None else x
    return jnp.transpose(cat + residual, (0, 3, 1, 2))


# ----------------------------------------------------------------------------
# Deterministic parameter init + run
# ----------------------------------------------------------------------------
def init_bn(k, C):
    k1, k2, k3, k4 = jax.random.split(k, 4)
    gamma = jax.random.uniform(k1, (C,), jnp.float32, 0.5, 1.5)
    beta = 0.1 * jax.random.normal(k2, (C,), jnp.float32)
    mean = 0.1 * jax.random.normal(k3, (C,), jnp.float32)
    var = jax.random.uniform(k4, (C,), jnp.float32, 0.5, 1.5)
    return (gamma, beta, mean, var)


def init_conv(k, cout, cin, kh, kw):
    return 0.1 * jax.random.normal(k, (cout, cin, kh, kw), jnp.float32)


def make_params(key, in_planes, out_planes):
    c1, c2, c3 = out_planes // 2, out_planes // 4, out_planes // 4
    ks = jax.random.split(key, 8)
    params = {
        "bn1": init_bn(ks[0], in_planes),
        "conv1_w": init_conv(ks[1], c1, in_planes, 3, 3),
        "bn2": init_bn(ks[2], c1),
        "conv2_w": init_conv(ks[3], c2, c1, 3, 3),
        "bn3": init_bn(ks[4], c2),
        "conv3_w": init_conv(ks[5], c3, c2, 3, 3),
    }
    if in_planes != out_planes:
        params["down_bn"] = init_bn(ks[6], in_planes)
        params["down_w"] = init_conv(ks[7], out_planes, in_planes, 1, 1)
    else:
        params["down_bn"] = None
        params["down_w"] = None
    return params


if __name__ == "__main__":
    key = jax.random.PRNGKey(0)
    N, H, W = 2, 16, 16
    k_p1, k_x1, k_p2, k_x2 = jax.random.split(key, 4)

    # Case 1: in_planes != out_planes (downsample path).
    in_planes, out_planes = 8, 16
    params1 = make_params(k_p1, in_planes, out_planes)
    x1 = jax.random.normal(k_x1, (N, in_planes, H, W), jnp.float32)

    out1 = jax.block_until_ready(conv_block_forward(x1, params1))
    ref1 = jax.block_until_ready(reference_forward(x1, params1))
    assert out1.shape == (N, out_planes, H, W), out1.shape
    # Tolerance sized for bf16 MXU operands (f32 accumulation).
    assert jnp.allclose(out1, ref1, rtol=3e-2, atol=3e-2), float(
        jnp.max(jnp.abs(out1 - ref1)))

    # Case 2: in_planes == out_planes (identity residual, no downsample).
    in_planes = out_planes = 16
    params2 = make_params(k_p2, in_planes, out_planes)
    x2 = jax.random.normal(k_x2, (N, in_planes, H, W), jnp.float32)

    out2 = jax.block_until_ready(conv_block_forward(x2, params2))
    ref2 = jax.block_until_ready(reference_forward(x2, params2))
    assert out2.shape == (N, out_planes, H, W), out2.shape
    assert jnp.allclose(out2, ref2, rtol=3e-2, atol=3e-2), float(
        jnp.max(jnp.abs(out2 - ref2)))

    print("KERNEL_OK")
</pallas_src>

<mosaic_0001>
module attributes {stable_mosaic.version = 11 : i64} {
  func.func @kernel(%arg0: i32, %arg1: memref<1x16x128xf32, #tpu.memory_space<vmem>>, %arg2: memref<1x128xf32, #tpu.memory_space<vmem>>, %arg3: memref<1x128xf32, #tpu.memory_space<vmem>>, %arg4: memref<3x128x128xbf16, #tpu.memory_space<vmem>>, %arg5: memref<128x256xf32, #tpu.memory_space<vmem>>, %arg6: memref<1x128xf32, #tpu.memory_space<vmem>>, %arg7: memref<1x128xf32, #tpu.memory_space<vmem>>, %arg8: memref<3x128x64xbf16, #tpu.memory_space<vmem>>, %arg9: memref<64x256xf32, #tpu.memory_space<vmem>>, %arg10: memref<1x64xf32, #tpu.memory_space<vmem>>, %arg11: memref<1x64xf32, #tpu.memory_space<vmem>>, %arg12: memref<3x64x64xbf16, #tpu.memory_space<vmem>>, %arg13: memref<64x256xf32, #tpu.memory_space<vmem>>, %arg14: memref<1x128xf32, #tpu.memory_space<vmem>>, %arg15: memref<1x128xf32, #tpu.memory_space<vmem>>, %arg16: memref<128x256xbf16, #tpu.memory_space<vmem>>, %arg17: memref<1x16x256xf32, #tpu.memory_space<vmem>>) attributes {dimension_semantics = [#tpu.dimension_semantics<parallel>], iteration_bounds = array<i64: 2>, scalar_prefetch = 0 : i64, scratch_operands = 0 : i64, tpu.core_type = #tpu.core_type<tc>, window_params = [{transform_indices = @transform_0, window_bounds = array<i64: 1, 16, 128>}, {pipeline_mode = #tpu.pipeline_mode<synchronous>, transform_indices = @transform_1, window_bounds = array<i64: 1, 128>}, {pipeline_mode = #tpu.pipeline_mode<synchronous>, transform_indices = @transform_2, window_bounds = array<i64: 1, 128>}, {pipeline_mode = #tpu.pipeline_mode<synchronous>, transform_indices = @transform_3, window_bounds = array<i64: 3, 128, 128>}, {pipeline_mode = #tpu.pipeline_mode<synchronous>, transform_indices = @transform_4, window_bounds = array<i64: 128, 256>}, {pipeline_mode = #tpu.pipeline_mode<synchronous>, transform_indices = @transform_5, window_bounds = array<i64: 1, 128>}, {pipeline_mode = #tpu.pipeline_mode<synchronous>, transform_indices = @transform_6, window_bounds = array<i64: 1, 128>}, {pipeline_mode = #tpu.pipeline_mode<synchronous>, transform_indices = @transform_7, window_bounds = array<i64: 3, 128, 64>}, {pipeline_mode = #tpu.pipeline_mode<synchronous>, transform_indices = @transform_8, window_bounds = array<i64: 64, 256>}, {pipeline_mode = #tpu.pipeline_mode<synchronous>, transform_indices = @transform_9, window_bounds = array<i64: 1, 64>}, {pipeline_mode = #tpu.pipeline_mode<synchronous>, transform_indices = @transform_10, window_bounds = array<i64: 1, 64>}, {pipeline_mode = #tpu.pipeline_mode<synchronous>, transform_indices = @transform_11, window_bounds = array<i64: 3, 64, 64>}, {pipeline_mode = #tpu.pipeline_mode<synchronous>, transform_indices = @transform_12, window_bounds = array<i64: 64, 256>}, {pipeline_mode = #tpu.pipeline_mode<synchronous>, transform_indices = @transform_13, window_bounds = array<i64: 1, 128>}, {pipeline_mode = #tpu.pipeline_mode<synchronous>, transform_indices = @transform_14, window_bounds = array<i64: 1, 128>}, {pipeline_mode = #tpu.pipeline_mode<synchronous>, transform_indices = @transform_15, window_bounds = array<i64: 128, 256>}, {transform_indices = @transform_16, window_bounds = array<i64: 1, 16, 256>}]} {
    %0 = tpu.iota {dimensions = array<i32: 0>} : vector<16x16xi32>
    %1 = tpu.iota {dimensions = array<i32: 1>} : vector<16x16xi32>
    %c1_i32 = arith.constant 1 : i32
    %2 = vector.broadcast %c1_i32 : i32 to vector<16x16xi32>
    %3 = arith.subi %0, %2 : vector<16x16xi32>
    %4 = arith.cmpi eq, %1, %3 : vector<16x16xi32>
    %cst = arith.constant 1.000000e+00 : f32
    %cst_0 = arith.constant 0.000000e+00 : f32
    %5 = vector.broadcast %cst : f32 to vector<16x16xf32>
    %6 = vector.broadcast %cst_0 : f32 to vector<16x16xf32>
    %7 = arith.select %4, %5, %6 : vector<16x16xi1>, vector<16x16xf32>
    %8 = arith.truncf %7 : vector<16x16xf32> to vector<16x16xbf16>
    %c1_i32_1 = arith.constant 1 : i32
    %9 = vector.broadcast %c1_i32_1 : i32 to vector<16x16xi32>
    %10 = arith.addi %0, %9 : vector<16x16xi32>
    %11 = arith.cmpi eq, %1, %10 : vector<16x16xi32>
    %cst_2 = arith.constant 1.000000e+00 : f32
    %cst_3 = arith.constant 0.000000e+00 : f32
    %12 = vector.broadcast %cst_2 : f32 to vector<16x16xf32>
    %13 = vector.broadcast %cst_3 : f32 to vector<16x16xf32>
    %14 = arith.select %11, %12, %13 : vector<16x16xi1>, vector<16x16xf32>
    %15 = arith.truncf %14 : vector<16x16xf32> to vector<16x16xbf16>
    %c0 = arith.constant 0 : index
    %c0_4 = arith.constant 0 : index
    %c0_5 = arith.constant 0 : index
    %16 = vector.load %arg1[%c0, %c0_4, %c0_5] : memref<1x16x128xf32, #tpu.memory_space<vmem>>, vector<1x16x128xf32>
    %17 = vector.shape_cast %16 : vector<1x16x128xf32> to vector<16x128xf32>
    %c0_6 = arith.constant 0 : index
    %c0_7 = arith.constant 0 : index
    %18 = vector.load %arg2[%c0_6, %c0_7] : memref<1x128xf32, #tpu.memory_space<vmem>>, vector<1x128xf32>
    %19 = vector.broadcast %18 : vector<1x128xf32> to vector<16x128xf32>
    %20 = arith.mulf %17, %19 : vector<16x128xf32>
    %c0_8 = arith.constant 0 : index
    %c0_9 = arith.constant 0 : index
    %21 = vector.load %arg3[%c0_8, %c0_9] : memref<1x128xf32, #tpu.memory_space<vmem>>, vector<1x128xf32>
    %22 = vector.broadcast %21 : vector<1x128xf32> to vector<16x128xf32>
    %23 = arith.addf %20, %22 : vector<16x128xf32>
    %cst_10 = arith.constant 0.000000e+00 : f32
    %24 = vector.broadcast %cst_10 : f32 to vector<16x128xf32>
    %25 = arith.maximumf %23, %24 : vector<16x128xf32>
    %26 = arith.truncf %25 : vector<16x128xf32> to vector<16x128xbf16>
    %cst_11 = arith.constant dense<0.000000e+00> : vector<16x128xf32>
    %27 = tpu.matmul %8, %26, %cst_11 {dimension_numbers = #tpu.dot_dimension_numbers<[1], [0], [0], [1], [0, 0, 1, 1], [], []>} : vector<16x16xbf16>, vector<16x128xbf16>, vector<16x128xf32> -> vector<16x128xf32>
    %28 = arith.truncf %27 : vector<16x128xf32> to vector<16x128xbf16>
    %cst_12 = arith.constant dense<0.000000e+00> : vector<16x128xf32>
    %29 = tpu.matmul %15, %26, %cst_12 {dimension_numbers = #tpu.dot_dimension_numbers<[1], [0], [0], [1], [0, 0, 1, 1], [], []>} : vector<16x16xbf16>, vector<16x128xbf16>, vector<16x128xf32> -> vector<16x128xf32>
    %30 = arith.truncf %29 : vector<16x128xf32> to vector<16x128xbf16>
    %c0_13 = arith.constant 0 : index
    %c0_14 = arith.constant 0 : index
    %c0_15 = arith.constant 0 : index
    %31 = vector.load %arg4[%c0_13, %c0_14, %c0_15] : memref<3x128x128xbf16, #tpu.memory_space<vmem>>, vector<1x128x128xbf16>
    %32 = vector.shape_cast %31 : vector<1x128x128xbf16> to vector<128x128xbf16>
    %cst_16 = arith.constant dense<0.000000e+00> : vector<16x128xf32>
    %33 = tpu.matmul %28, %32, %cst_16 {dimension_numbers = #tpu.dot_dimension_numbers<[1], [0], [0], [1], [0, 0, 1, 1], [], []>} : vector<16x128xbf16>, vector<128x128xbf16>, vector<16x128xf32> -> vector<16x128xf32>
    %c1 = arith.constant 1 : index
    %c0_17 = arith.constant 0 : index
    %c0_18 = arith.constant 0 : index
    %34 = vector.load %arg4[%c1, %c0_17, %c0_18] : memref<3x128x128xbf16, #tpu.memory_space<vmem>>, vector<1x128x128xbf16>
    %35 = vector.shape_cast %34 : vector<1x128x128xbf16> to vector<128x128xbf16>
    %cst_19 = arith.constant dense<0.000000e+00> : vector<16x128xf32>
    %36 = tpu.matmul %26, %35, %cst_19 {dimension_numbers = #tpu.dot_dimension_numbers<[1], [0], [0], [1], [0, 0, 1, 1], [], []>} : vector<16x128xbf16>, vector<128x128xbf16>, vector<16x128xf32> -> vector<16x128xf32>
    %37 = arith.addf %33, %36 : vector<16x128xf32>
    %c2 = arith.constant 2 : index
    %c0_20 = arith.constant 0 : index
    %c0_21 = arith.constant 0 : index
    %38 = vector.load %arg4[%c2, %c0_20, %c0_21] : memref<3x128x128xbf16, #tpu.memory_space<vmem>>, vector<1x128x128xbf16>
    %39 = vector.shape_cast %38 : vector<1x128x128xbf16> to vector<128x128xbf16>
    %cst_22 = arith.constant dense<0.000000e+00> : vector<16x128xf32>
    %40 = tpu.matmul %30, %39, %cst_22 {dimension_numbers = #tpu.dot_dimension_numbers<[1], [0], [0], [1], [0, 0, 1, 1], [], []>} : vector<16x128xbf16>, vector<128x128xbf16>, vector<16x128xf32> -> vector<16x128xf32>
    %41 = arith.addf %37, %40 : vector<16x128xf32>
    %c0_23 = arith.constant 0 : index
    %c0_24 = arith.constant 0 : index
    %42 = vector.load %arg6[%c0_23, %c0_24] : memref<1x128xf32, #tpu.memory_space<vmem>>, vector<1x128xf32>
    %43 = vector.broadcast %42 : vector<1x128xf32> to vector<16x128xf32>
    %44 = arith.mulf %41, %43 : vector<16x128xf32>
    %c0_25 = arith.constant 0 : index
    %c0_26 = arith.constant 0 : index
    %45 = vector.load %arg7[%c0_25, %c0_26] : memref<1x128xf32, #tpu.memory_space<vmem>>, vector<1x128xf32>
    %46 = vector.broadcast %45 : vector<1x128xf32> to vector<16x128xf32>
    %47 = arith.addf %44, %46 : vector<16x128xf32>
    %cst_27 = arith.constant 0.000000e+00 : f32
    %48 = vector.broadcast %cst_27 : f32 to vector<16x128xf32>
    %49 = arith.maximumf %47, %48 : vector<16x128xf32>
    %50 = arith.truncf %49 : vector<16x128xf32> to vector<16x128xbf16>
    %cst_28 = arith.constant dense<0.000000e+00> : vector<16x128xf32>
    %51 = tpu.matmul %8, %50, %cst_28 {dimension_numbers = #tpu.dot_dimension_numbers<[1], [0], [0], [1], [0, 0, 1, 1], [], []>} : vector<16x16xbf16>, vector<16x128xbf16>, vector<16x128xf32> -> vector<16x128xf32>
    %52 = arith.truncf %51 : vector<16x128xf32> to vector<16x128xbf16>
    %cst_29 = arith.constant dense<0.000000e+00> : vector<16x128xf32>
    %53 = tpu.matmul %15, %50, %cst_29 {dimension_numbers = #tpu.dot_dimension_numbers<[1], [0], [0], [1], [0, 0, 1, 1], [], []>} : vector<16x16xbf16>, vector<16x128xbf16>, vector<16x128xf32> -> vector<16x128xf32>
    %54 = arith.truncf %53 : vector<16x128xf32> to vector<16x128xbf16>
    %c0_30 = arith.constant 0 : index
    %c0_31 = arith.constant 0 : index
    %c0_32 = arith.constant 0 : index
    %55 = vector.load %arg8[%c0_30, %c0_31, %c0_32] : memref<3x128x64xbf16, #tpu.memory_space<vmem>>, vector<1x128x64xbf16>
    %56 = vector.shape_cast %55 : vector<1x128x64xbf16> to vector<128x64xbf16>
    %cst_33 = arith.constant dense<0.000000e+00> : vector<16x64xf32>
    %57 = tpu.matmul %52, %56, %cst_33 {dimension_numbers = #tpu.dot_dimension_numbers<[1], [0], [0], [1], [0, 0, 1, 1], [], []>} : vector<16x128xbf16>, vector<128x64xbf16>, vector<16x64xf32> -> vector<16x64xf32>
    %c1_34 = arith.constant 1 : index
    %c0_35 = arith.constant 0 : index
    %c0_36 = arith.constant 0 : index
    %58 = vector.load %arg8[%c1_34, %c0_35, %c0_36] : memref<3x128x64xbf16, #tpu.memory_space<vmem>>, vector<1x128x64xbf16>
    %59 = vector.shape_cast %58 : vector<1x128x64xbf16> to vector<128x64xbf16>
    %cst_37 = arith.constant dense<0.000000e+00> : vector<16x64xf32>
    %60 = tpu.matmul %50, %59, %cst_37 {dimension_numbers = #tpu.dot_dimension_numbers<[1], [0], [0], [1], [0, 0, 1, 1], [], []>} : vector<16x128xbf16>, vector<128x64xbf16>, vector<16x64xf32> -> vector<16x64xf32>
    %61 = arith.addf %57, %60 : vector<16x64xf32>
    %c2_38 = arith.constant 2 : index
    %c0_39 = arith.constant 0 : index
    %c0_40 = arith.constant 0 : index
    %62 = vector.load %arg8[%c2_38, %c0_39, %c0_40] : memref<3x128x64xbf16, #tpu.memory_space<vmem>>, vector<1x128x64xbf16>
    %63 = vector.shape_cast %62 : vector<1x128x64xbf16> to vector<128x64xbf16>
    %cst_41 = arith.constant dense<0.000000e+00> : vector<16x64xf32>
    %64 = tpu.matmul %54, %63, %cst_41 {dimension_numbers = #tpu.dot_dimension_numbers<[1], [0], [0], [1], [0, 0, 1, 1], [], []>} : vector<16x128xbf16>, vector<128x64xbf16>, vector<16x64xf32> -> vector<16x64xf32>
    %65 = arith.addf %61, %64 : vector<16x64xf32>
    %c0_42 = arith.constant 0 : index
    %c0_43 = arith.constant 0 : index
    %66 = vector.load %arg10[%c0_42, %c0_43] : memref<1x64xf32, #tpu.memory_space<vmem>>, vector<1x64xf32>
    %67 = vector.broadcast %66 : vector<1x64xf32> to vector<16x64xf32>
    %68 = arith.mulf %65, %67 : vector<16x64xf32>
    %c0_44 = arith.constant 0 : index
    %c0_45 = arith.constant 0 : index
    %69 = vector.load %arg11[%c0_44, %c0_45] : memref<1x64xf32, #tpu.memory_space<vmem>>, vector<1x64xf32>
    %70 = vector.broadcast %69 : vector<1x64xf32> to vector<16x64xf32>
    %71 = arith.addf %68, %70 : vector<16x64xf32>
    %cst_46 = arith.constant 0.000000e+00 : f32
    %72 = vector.broadcast %cst_46 : f32 to vector<16x64xf32>
    %73 = arith.maximumf %71, %72 : vector<16x64xf32>
    %74 = arith.truncf %73 : vector<16x64xf32> to vector<16x64xbf16>
    %cst_47 = arith.constant dense<0.000000e+00> : vector<16x64xf32>
    %75 = tpu.matmul %8, %74, %cst_47 {dimension_numbers = #tpu.dot_dimension_numbers<[1], [0], [0], [1], [0, 0, 1, 1], [], []>} : vector<16x16xbf16>, vector<16x64xbf16>, vector<16x64xf32> -> vector<16x64xf32>
    %76 = arith.truncf %75 : vector<16x64xf32> to vector<16x64xbf16>
    %cst_48 = arith.constant dense<0.000000e+00> : vector<16x64xf32>
    %77 = tpu.matmul %15, %74, %cst_48 {dimension_numbers = #tpu.dot_dimension_numbers<[1], [0], [0], [1], [0, 0, 1, 1], [], []>} : vector<16x16xbf16>, vector<16x64xbf16>, vector<16x64xf32> -> vector<16x64xf32>
    %78 = arith.truncf %77 : vector<16x64xf32> to vector<16x64xbf16>
    %c0_49 = arith.constant 0 : index
    %c0_50 = arith.constant 0 : index
    %c0_51 = arith.constant 0 : index
    %79 = vector.load %arg12[%c0_49, %c0_50, %c0_51] : memref<3x64x64xbf16, #tpu.memory_space<vmem>>, vector<1x64x64xbf16>
    %80 = vector.shape_cast %79 : vector<1x64x64xbf16> to vector<64x64xbf16>
    %cst_52 = arith.constant dense<0.000000e+00> : vector<16x64xf32>
    %81 = tpu.matmul %76, %80, %cst_52 {dimension_numbers = #tpu.dot_dimension_numbers<[1], [0], [0], [1], [0, 0, 1, 1], [], []>} : vector<16x64xbf16>, vector<64x64xbf16>, vector<16x64xf32> -> vector<16x64xf32>
    %c1_53 = arith.constant 1 : index
    %c0_54 = arith.constant 0 : index
    %c0_55 = arith.constant 0 : index
    %82 = vector.load %arg12[%c1_53, %c0_54, %c0_55] : memref<3x64x64xbf16, #tpu.memory_space<vmem>>, vector<1x64x64xbf16>
    %83 = vector.shape_cast %82 : vector<1x64x64xbf16> to vector<64x64xbf16>
    %cst_56 = arith.constant dense<0.000000e+00> : vector<16x64xf32>
    %84 = tpu.matmul %74, %83, %cst_56 {dimension_numbers = #tpu.dot_dimension_numbers<[1], [0], [0], [1], [0, 0, 1, 1], [], []>} : vector<16x64xbf16>, vector<64x64xbf16>, vector<16x64xf32> -> vector<16x64xf32>
    %85 = arith.addf %81, %84 : vector<16x64xf32>
    %c2_57 = arith.constant 2 : index
    %c0_58 = arith.constant 0 : index
    %c0_59 = arith.constant 0 : index
    %86 = vector.load %arg12[%c2_57, %c0_58, %c0_59] : memref<3x64x64xbf16, #tpu.memory_space<vmem>>, vector<1x64x64xbf16>
    %87 = vector.shape_cast %86 : vector<1x64x64xbf16> to vector<64x64xbf16>
    %cst_60 = arith.constant dense<0.000000e+00> : vector<16x64xf32>
    %88 = tpu.matmul %78, %87, %cst_60 {dimension_numbers = #tpu.dot_dimension_numbers<[1], [0], [0], [1], [0, 0, 1, 1], [], []>} : vector<16x64xbf16>, vector<64x64xbf16>, vector<16x64xf32> -> vector<16x64xf32>
    %89 = arith.addf %85, %88 : vector<16x64xf32>
    %c0_61 = arith.constant 0 : index
    %c0_62 = arith.constant 0 : index
    %90 = vector.load %arg5[%c0_61, %c0_62] : memref<128x256xf32, #tpu.memory_space<vmem>>, vector<128x256xf32>
    %cst_63 = arith.constant dense<0.000000e+00> : vector<16x256xf32>
    %91 = tpu.matmul %41, %90, %cst_63 {dimension_numbers = #tpu.dot_dimension_numbers<[1], [0], [0], [1], [0, 0, 1, 1], [], []>} : vector<16x128xf32>, vector<128x256xf32>, vector<16x256xf32> -> vector<16x256xf32>
    %c0_64 = arith.constant 0 : index
    %c0_65 = arith.constant 0 : index
    %92 = vector.load %arg9[%c0_64, %c0_65] : memref<64x256xf32, #tpu.memory_space<vmem>>, vector<64x256xf32>
    %cst_66 = arith.constant dense<0.000000e+00> : vector<16x256xf32>
    %93 = tpu.matmul %65, %92, %cst_66 {dimension_numbers = #tpu.dot_dimension_numbers<[1], [0], [0], [1], [0, 0, 1, 1], [], []>} : vector<16x64xf32>, vector<64x256xf32>, vector<16x256xf32> -> vector<16x256xf32>
    %94 = arith.addf %91, %93 : vector<16x256xf32>
    %c0_67 = arith.constant 0 : index
    %c0_68 = arith.constant 0 : index
    %95 = vector.load %arg13[%c0_67, %c0_68] : memref<64x256xf32, #tpu.memory_space<vmem>>, vector<64x256xf32>
    %cst_69 = arith.constant dense<0.000000e+00> : vector<16x256xf32>
    %96 = tpu.matmul %89, %95, %cst_69 {dimension_numbers = #tpu.dot_dimension_numbers<[1], [0], [0], [1], [0, 0, 1, 1], [], []>} : vector<16x64xf32>, vector<64x256xf32>, vector<16x256xf32> -> vector<16x256xf32>
    %97 = arith.addf %94, %96 : vector<16x256xf32>
    %c0_70 = arith.constant 0 : index
    %c0_71 = arith.constant 0 : index
    %98 = vector.load %arg14[%c0_70, %c0_71] : memref<1x128xf32, #tpu.memory_space<vmem>>, vector<1x128xf32>
    %99 = vector.broadcast %98 : vector<1x128xf32> to vector<16x128xf32>
    %100 = arith.mulf %17, %99 : vector<16x128xf32>
    %c0_72 = arith.constant 0 : index
    %c0_73 = arith.constant 0 : index
    %101 = vector.load %arg15[%c0_72, %c0_73] : memref<1x128xf32, #tpu.memory_space<vmem>>, vector<1x128xf32>
    %102 = vector.broadcast %101 : vector<1x128xf32> to vector<16x128xf32>
    %103 = arith.addf %100, %102 : vector<16x128xf32>
    %cst_74 = arith.constant 0.000000e+00 : f32
    %104 = vector.broadcast %cst_74 : f32 to vector<16x128xf32>
    %105 = arith.maximumf %103, %104 : vector<16x128xf32>
    %106 = arith.truncf %105 : vector<16x128xf32> to vector<16x128xbf16>
    %c0_75 = arith.constant 0 : index
    %c0_76 = arith.constant 0 : index
    %107 = vector.load %arg16[%c0_75, %c0_76] : memref<128x256xbf16, #tpu.memory_space<vmem>>, vector<128x256xbf16>
    %cst_77 = arith.constant dense<0.000000e+00> : vector<16x256xf32>
    %108 = tpu.matmul %106, %107, %cst_77 {dimension_numbers = #tpu.dot_dimension_numbers<[1], [0], [0], [1], [0, 0, 1, 1], [], []>} : vector<16x128xbf16>, vector<128x256xbf16>, vector<16x256xf32> -> vector<16x256xf32>
    %109 = arith.addf %97, %108 : vector<16x256xf32>
    %c0_78 = arith.constant 0 : index
    %c0_79 = arith.constant 0 : index
    %c0_80 = arith.constant 0 : index
    %110 = vector.load %arg17[%c0_78, %c0_79, %c0_80] : memref<1x16x256xf32, #tpu.memory_space<vmem>>, vector<1x16x256xf32>
    %111 = vector.shape_cast %110 : vector<1x16x256xf32> to vector<16x256xf32>
    %112 = vector.shape_cast %109 : vector<16x256xf32> to vector<1x16x256xf32>
    tpu.vector_store %arg17[%c0_78, %c0_79, %c0_80], %112 {strides = array<i32>} : memref<1x16x256xf32, #tpu.memory_space<vmem>>, vector<1x16x256xf32>,
    return
  }
  func.func @transform_0(%arg0: i32) -> (i32, i32, i32) {
    %c0_i32 = arith.constant 0 : i32
    %c0_i32_0 = arith.constant 0 : i32
    %c0_i32_1 = arith.constant 0 : i32
    return %arg0, %c0_i32, %c0_i32_0 : i32, i32, i32
  }
  func.func @transform_1(%arg0: i32) -> (i32, i32) {
    %c0_i32 = arith.constant 0 : i32
    %c0_i32_0 = arith.constant 0 : i32
    %c0_i32_1 = arith.constant 0 : i32
    return %c0_i32, %c0_i32_0 : i32, i32
  }
  func.func @transform_2(%arg0: i32) -> (i32, i32) {
    %c0_i32 = arith.constant 0 : i32
    %c0_i32_0 = arith.constant 0 : i32
    %c0_i32_1 = arith.constant 0 : i32
    return %c0_i32, %c0_i32_0 : i32, i32
  }
  func.func @transform_3(%arg0: i32) -> (i32, i32, i32) {
    %c0_i32 = arith.constant 0 : i32
    %c0_i32_0 = arith.constant 0 : i32
    %c0_i32_1 = arith.constant 0 : i32
    %c0_i32_2 = arith.constant 0 : i32
    return %c0_i32, %c0_i32_0, %c0_i32_1 : i32, i32, i32
  }
  func.func @transform_4(%arg0: i32) -> (i32, i32) {
    %c0_i32 = arith.constant 0 : i32
    %c0_i32_0 = arith.constant 0 : i32
    %c0_i32_1 = arith.constant 0 : i32
    return %c0_i32, %c0_i32_0 : i32, i32
  }
  func.func @transform_5(%arg0: i32) -> (i32, i32) {
    %c0_i32 = arith.constant 0 : i32
    %c0_i32_0 = arith.constant 0 : i32
    %c0_i32_1 = arith.constant 0 : i32
    return %c0_i32, %c0_i32_0 : i32, i32
  }
  func.func @transform_6(%arg0: i32) -> (i32, i32) {
    %c0_i32 = arith.constant 0 : i32
    %c0_i32_0 = arith.constant 0 : i32
    %c0_i32_1 = arith.constant 0 : i32
    return %c0_i32, %c0_i32_0 : i32, i32
  }
  func.func @transform_7(%arg0: i32) -> (i32, i32, i32) {
    %c0_i32 = arith.constant 0 : i32
    %c0_i32_0 = arith.constant 0 : i32
    %c0_i32_1 = arith.constant 0 : i32
    %c0_i32_2 = arith.constant 0 : i32
    return %c0_i32, %c0_i32_0, %c0_i32_1 : i32, i32, i32
  }
  func.func @transform_8(%arg0: i32) -> (i32, i32) {
    %c0_i32 = arith.constant 0 : i32
    %c0_i32_0 = arith.constant 0 : i32
    %c0_i32_1 = arith.constant 0 : i32
    return %c0_i32, %c0_i32_0 : i32, i32
  }
  func.func @transform_9(%arg0: i32) -> (i32, i32) {
    %c0_i32 = arith.constant 0 : i32
    %c0_i32_0 = arith.constant 0 : i32
    %c0_i32_1 = arith.constant 0 : i32
    return %c0_i32, %c0_i32_0 : i32, i32
  }
  func.func @transform_10(%arg0: i32) -> (i32, i32) {
    %c0_i32 = arith.constant 0 : i32
    %c0_i32_0 = arith.constant 0 : i32
    %c0_i32_1 = arith.constant 0 : i32
    return %c0_i32, %c0_i32_0 : i32, i32
  }
  func.func @transform_11(%arg0: i32) -> (i32, i32, i32) {
    %c0_i32 = arith.constant 0 : i32
    %c0_i32_0 = arith.constant 0 : i32
    %c0_i32_1 = arith.constant 0 : i32
    %c0_i32_2 = arith.constant 0 : i32
    return %c0_i32, %c0_i32_0, %c0_i32_1 : i32, i32, i32
  }
  func.func @transform_12(%arg0: i32) -> (i32, i32) {
    %c0_i32 = arith.constant 0 : i32
    %c0_i32_0 = arith.constant 0 : i32
    %c0_i32_1 = arith.constant 0 : i32
    return %c0_i32, %c0_i32_0 : i32, i32
  }
  func.func @transform_13(%arg0: i32) -> (i32, i32) {
    %c0_i32 = arith.constant 0 : i32
    %c0_i32_0 = arith.constant 0 : i32
    %c0_i32_1 = arith.constant 0 : i32
    return %c0_i32, %c0_i32_0 : i32, i32
  }
  func.func @transform_14(%arg0: i32) -> (i32, i32) {
    %c0_i32 = arith.constant 0 : i32
    %c0_i32_0 = arith.constant 0 : i32
    %c0_i32_1 = arith.constant 0 : i32
    return %c0_i32, %c0_i32_0 : i32, i32
  }
  func.func @transform_15(%arg0: i32) -> (i32, i32) {
    %c0_i32 = arith.constant 0 : i32
    %c0_i32_0 = arith.constant 0 : i32
    %c0_i32_1 = arith.constant 0 : i32
    return %c0_i32, %c0_i32_0 : i32, i32
  }
  func.func @transform_16(%arg0: i32) -> (i32, i32, i32) {
    %c0_i32 = arith.constant 0 : i32
    %c0_i32_0 = arith.constant 0 : i32
    %c0_i32_1 = arith.constant 0 : i32
    return %arg0, %c0_i32, %c0_i32_0 : i32, i32, i32
  }
}

</mosaic_0001>

<bundles_post_ra>
// kernel: tpu_custom_call.1
= control target key start
LH: loop header
LB: loop body
LE: loop exit
PB: predicated region body
PF: predicated region fallthrough
CT: control target
= control target key end

     0   :  { %s4033_s0 = inlined_call_operand.vmem [shape: f32[2,16,128], index: 0, kind: input, shape index: {}]   ;;  %s4034_s1 = inlined_call_operand.vmem [shape: f32[1,128], index: 1, kind: input, shape index: {}]   ;;  %s4035_s2 = inlined_call_operand.vmem [shape: f32[1,128], index: 2, kind: input, shape index: {}]   ;;  %s4036_s3 = inlined_call_operand.hbm [shape: bf16[3,128,128], index: 3, kind: input, shape index: {}]   ;;  %s4037_s4 = inlined_call_operand.vmem [shape: f32[128,256], index: 4, kind: input, shape index: {}]   ;;  %s4038_s5 = inlined_call_operand.vmem [shape: f32[1,128], index: 5, kind: input, shape index: {}]   ;;  %s4039_s6 = inlined_call_operand.vmem [shape: f32[1,128], index: 6, kind: input, shape index: {}]   ;;  %s4040_s7 = inlined_call_operand.vmem [shape: bf16[3,128,64], index: 7, kind: input, shape index: {}]   ;;  %s4041_s8 = inlined_call_operand.hbm [shape: f32[64,256], index: 8, kind: input, shape index: {}]   ;;  %s4042_s9 = inlined_call_operand.vmem [shape: f32[1,64], index: 9, kind: input, shape index: {}]   ;;  %s4043_s10 = inlined_call_operand.vmem [shape: f32[1,64], index: 10, kind: input, shape index: {}]   ;;  %s4044_s11 = inlined_call_operand.hbm [shape: bf16[3,64,64], index: 11, kind: input, shape index: {}]   ;;  %s4045_s12 = inlined_call_operand.hbm [shape: f32[64,256], index: 12, kind: input, shape index: {}]   ;;  %s4046_s13 = inlined_call_operand.vmem [shape: f32[1,128], index: 13, kind: input, shape index: {}]   ;;  %s4047_s14 = inlined_call_operand.vmem [shape: f32[1,128], index: 14, kind: input, shape index: {}]   ;;  %s4048_s15 = inlined_call_operand.hbm [shape: bf16[128,256], index: 15, kind: input, shape index: {}]   ;;  %s4049_s16 = inlined_call_operand.hbm [shape: f32[2,16,256], index: 16, kind: output, shape index: {}]  }
   0x1   :  { %4063 = sst [smem:[#allocation24_spill]] %s4033_s0 }
   0x2   :  { %4064 = sst [smem:[#allocation25_spill]] %s4041_s8 }
   0x3   :  { %4065 = sst [smem:[#allocation26_spill]] %s4045_s12 }
   0x4   :  { %4066 = sst [smem:[#allocation27_spill]] %s4046_s13 }
   0x5   :  { %4067 = sst [smem:[#allocation28_spill]] %s4047_s14 }
   0x6   :  { %4068 = sst [smem:[#allocation29_spill]] %s4049_s16 }
   0x7   :  { %21 = vsyncpa [#allocation3], 0 }
   0x8   :  { %22 = vsyncpa [#allocation6], 0 }
   0x9   :  { %23 = vsyncpa [#allocation9], 0 }
   0xa   :  { %24 = vsyncpa [#allocation4], 0 }
   0xb   :  { %26 = vsyncpa [#allocation4 + $0x1], 0  ;;  %s3442_s21 = smov 0   ;;  %s3444_s22 = smov 0  }
   0xc   :  { %s3446_s23 = smov 0   ;;  %s3448_s24 = smov 0  }
   0xd LB: > { %4069 = sst [smem:[#allocation16_spill]] %s3326_s21  ;;  %s3463_s25 = sadd.s32 4294967295, %s3338_s24   ;;  %s3338_s24 = sphi %s3448_s24, %s4102_s24   ;;  %s3334_s23 = sphi %s3446_s23, %s4105_s23   ;;  %s3330_s22 = sphi %s3444_s22, %s4104_s22   ;;  %s3326_s21 = sphi %s3442_s21, %s4103_s21  }
   0xe   : > { %4070 = sst [smem:[#allocation17_spill]] %s3330_s22  ;;  %s2413_s26 = sadd.s32 4294967294, %s3338_s24  }
   0xf   : > { %4071 = sst [smem:[#allocation18_spill]] %s3334_s23  ;;  %s3467_s27 = sadd.s32 1, %s3338_s24  }
  0x10   : > { %4072 = sst [smem:[#allocation19_spill]] %s3338_s24  ;;  %s380_s28 = sadd.s32 1, %s3334_s23 }
  0x11   : > { %4073 = sst [smem:[#allocation20_spill]] %s3467_s27  ;;  %s377_s29 = ssub.s32 %s3338_s24, %s3467_s27 }
  0x12   : > { %p390_p0 = scmp.ne.s32.totalorder %s3334_s23, %s3330_s22  ;;  %p378_p1 = scmp.eq.s32.totalorder %s377_s29, 0 }
  0x13   : > { %p391_p2 = scmp.eq.s32.totalorder %s3463_s25, 1  ;;  %p396_p3 = scmp.ne.s32.totalorder %s3330_s22, %s3326_s21 }
  0x14   : > { %p397_p4 = scmp.eq.s32.totalorder %s2413_s26, 1  ;;  %p2414_p7 = scmp.ge.s32.totalorder %s3338_s24, 1 }
  0x15   : > { %s3478_s30 = scalar_select %p378_p1, %s3334_s23, %s380_s28  }
  0x16   : > { %p3480_p5 = por %p391_p2, %p390_p0  ;;  %p3484_p6 = por %p397_p4, %p396_p3 }
  0x17   : > { %4074 = sst [smem:[#allocation21_spill]] %s3478_s30  ;;  %p404_p8 = scmp.lt.s32.totalorder %s3338_s24, 3 }
  0x18   : > { %s4075_s0 = scalar_select %p3480_p5, 1, 0 }
  0x19   : > { %s4077_s17 = scalar_select %p3484_p6, 1, 0 }
  0x1a   : > { %4076 = sst [smem:[#allocation22_spill]] %s4075_s0  ;;  %p4057_p9 = scmp.eq.s32.totalorder %s3463_s25, 0 }
  0x1b   : > { %4078 = sst [smem:[#allocation23_spill]] %s4077_s17  ;;  %p3491_p10 = pnand %p2414_p7, %p404_p8 }
  0x1c   : > { %s3340_s19 = smov [#allocation5]   ;;  %s3341_s28 = smov [#allocation8]  }
  0x1d   : > { %s4079_s18 = scalar_select %p3491_p10, 1, 0 }
  0x1e   : > { %s447_s20 = sshll.u32 %s3340_s19, 4  ;;  %p2959_p11 = pneg %p3491_p10  ;;  %s3497_s20 = int_to_ptr.vmem [resolvable:$true] %s447_s20 }
  0x1f   : > { %s479_s29 = sshll.u32 %s3341_s28, 4  ;;  %s3342_s30 = smov [#allocation2]   ;;  %s3505_s29 = int_to_ptr.vmem [resolvable:$true] %s479_s29 }
  0x20   : > { %p3501_p12 = pnand %p4057_p9, %p2959_p11  ;;  %s3507_s23 = sshll.u32 %s3342_s30, 4  ;;  %s423_s23 = int_to_ptr.vmem [resolvable:$true] %s3507_s23 }
  0x21   : > { %s4081_s8 = sld [smem:[#allocation25_spill]] }
  0x22   : > { %p3517_p0 = pneg %p3501_p12 }
  0x27   : > { %s3124_s19 = scalar_lea.hbm %s4081_s8, 2048 }
  0x28   : > { %p3125_p13 = scmp.ne.s32.totalorder %s4081_s8, %s3124_s19  ;;  %p3131_p3 = scmp.lt.u32.totalorder %s3124_s19, %s4081_s8 }
  0x2a   : > { %p3127_p1 = pnand %p3517_p0, %p3125_p13 }
  0x2c   : > { %p3128_p2 = pneg %p3127_p1 }
  0x2e   : > { %p3133_p4 = pnand %p3131_p3, %p3128_p2 }
  0x30   : > { %3136 = shalt.err (!%p3133_p4)
}
  0x31   : > { %s3137_s21 = scalar_lea.vmem %s3497_s20, 2048  ;;  %p3145_p9 = scmp.lt.s32.totalorder %s3497_s20, %s3497_s20 }
  0x32   : > { %p3138_p7 = scmp.ne.s32.totalorder %s3497_s20, %s3137_s21  ;;  %p3146_p6 = scmp.lt.s32.totalorder %s3137_s21, %s3137_s21 }
  0x34   : > { %p3140_p8 = pnand %p3138_p7, %p3517_p0  ;;  %p3147_p13 = por %p3146_p6, %p3145_p9 }
  0x36   : > { %p3141_p11 = pneg %p3140_p8 }
  0x38   : > { %p3148_p1 = pnand %p3147_p13, %p3141_p11 }
  0x3a   : > { %3151 = shalt.err (!%p3148_p1)
}
  0x3b   : > { %s3343_s24 = smov 256   ;;  %s3344_s27 = smov 16  }
  0x3c   : > { %2965 = dma.hbm_to_vmem [thread:$0]  (!%p3501_p12), %s4081_s8, 2048, %s3497_s20, [#allocation6], %s3343_s24, %s3343_s24, %s3344_s27  }
  0x3d   : > { %s4083_s12 = sld [smem:[#allocation26_spill]] }
  0x43   : > { %s3152_s0 = scalar_lea.hbm %s4083_s12, 2048 }
  0x44   : > { %p3153_p6 = scmp.ne.s32.totalorder %s4083_s12, %s3152_s0  ;;  %p3159_p3 = scmp.lt.u32.totalorder %s3152_s0, %s4083_s12 }
  0x46   : > { %p3155_p9 = pnand %p3153_p6, %p3517_p0 }
  0x48   : > { %p3156_p2 = pneg %p3155_p9 }
  0x4a   : > { %p3161_p4 = pnand %p3159_p3, %p3156_p2 }
  0x4c   : > { %3164 = shalt.err (!%p3161_p4)
}
  0x4d   : > { %s3165_s20 = scalar_lea.vmem %s3505_s29, 2048  ;;  %p3173_p13 = scmp.lt.s32.totalorder %s3505_s29, %s3505_s29 }
  0x4e   : > { %p3166_p7 = scmp.ne.s32.totalorder %s3505_s29, %s3165_s20  ;;  %p3174_p1 = scmp.lt.s32.totalorder %s3165_s20, %s3165_s20 }
  0x50   : > { %p3168_p8 = pnand %p3166_p7, %p3517_p0  ;;  %p3175_p6 = por %p3174_p1, %p3173_p13 }
  0x52   : > { %p3169_p11 = pneg %p3168_p8 }
  0x54   : > { %p3176_p9 = pnand %p3175_p6, %p3169_p11 }
  0x56   : > { %3179 = shalt.err (!%p3176_p9)
}
  0x57   : > { %2971 = dma.hbm_to_vmem [thread:$0]  (!%p3501_p12), %s4083_s12, 2048, %s3505_s29, [#allocation9], %s3343_s24, %s3343_s24, %s3344_s27  }
  0x58   : > { %s3180_s17 = scalar_lea.hbm %s4036_s3, 3072 }
  0x59   : > { %p3181_p2 = scmp.ne.s32.totalorder %s4036_s3, %s3180_s17  ;;  %p3187_p7 = scmp.lt.u32.totalorder %s3180_s17, %s4036_s3 }
  0x5b   : > { %p3183_p3 = pnand %p3181_p2, %p3517_p0 }
  0x5d   : > { %p3184_p4 = pneg %p3183_p3 }
  0x5f   : > { %p3189_p8 = pnand %p3187_p7, %p3184_p4 }
  0x61   : > { %3192 = shalt.err (!%p3189_p8)
}
  0x62   : > { %s3193_s20 = scalar_lea.vmem %s423_s23, 3072  ;;  %p3201_p6 = scmp.lt.s32.totalorder %s423_s23, %s423_s23 }
  0x63   : > { %p3194_p11 = scmp.ne.s32.totalorder %s423_s23, %s3193_s20  ;;  %p3202_p9 = scmp.lt.s32.totalorder %s3193_s20, %s3193_s20 }
  0x65   : > { %p3196_p13 = pnand %p3194_p11, %p3517_p0  ;;  %p3203_p5 = por %p3202_p9, %p3201_p6 }
  0x67   : > { %p3197_p1 = pneg %p3196_p13 }
  0x69   : > { %p3204_p10 = pnand %p3203_p5, %p3197_p1 }
  0x6b   : > { %3207 = shalt.err (!%p3204_p10)
}
  0x6c   : > { %s3345_s29 = smov 64   ;;  %s3346_s24 = smov 4  }
  0x6d   : > { %2962 = dma.hbm_to_vmem [thread:$0]  (!%p3501_p12), %s4036_s3, 3072, %s423_s23, [#allocation3], %s3345_s29, %s3345_s29, %s3346_s24  }
  0x6e   : > { %s3347_s14 = smov [#allocation7]   ;;  %s3348_s0 = smov [#allocation10]  }
  0x6f   : > { %s466_s22 = sshll.u32 %s3347_s14, 4  ;;  %s498_s17 = sshll.u32 %s3348_s0, 4  ;;  %s467_s22 = int_to_ptr.vmem [resolvable:$true] %s466_s22  ;;  %s499_s17 = int_to_ptr.vmem [resolvable:$true] %s498_s17 }
  0x70   : > { %s3208_s30 = scalar_lea.hbm %s4044_s11, 1536 }
  0x71   : > { %p3209_p5 = scmp.ne.s32.totalorder %s4044_s11, %s3208_s30  ;;  %p3215_p3 = scmp.lt.u32.totalorder %s3208_s30, %s4044_s11 }
  0x73   : > { %p3211_p10 = pnand %p3209_p5, %p3517_p0 }
  0x75   : > { %p3212_p2 = pneg %p3211_p10 }
  0x77   : > { %p3217_p4 = pnand %p3215_p3, %p3212_p2 }
  0x79   : > { %3220 = shalt.err (!%p3217_p4)
}
  0x7a   : > { %s3221_s23 = scalar_lea.vmem %s467_s22, 1536  ;;  %p3229_p13 = scmp.lt.s32.totalorder %s467_s22, %s467_s22 }
  0x7b   : > { %p3222_p7 = scmp.ne.s32.totalorder %s467_s22, %s3221_s23  ;;  %p3230_p1 = scmp.lt.s32.totalorder %s3221_s23, %s3221_s23 }
  0x7d   : > { %p3224_p8 = pnand %p3222_p7, %p3517_p0  ;;  %p3231_p6 = por %p3230_p1, %p3229_p13 }
  0x7f   : > { %p3225_p11 = pneg %p3224_p8 }
  0x81   : > { %p3232_p9 = pnand %p3231_p6, %p3225_p11 }
  0x83   : > { %3235 = shalt.err (!%p3232_p9)
}
  0x84   : > { %2968 = dma.hbm_to_vmem [thread:$0]  (!%p3501_p12), %s4044_s11, 1536, %s467_s22, [#allocation6], %s3345_s29, %s3345_s29, %s3346_s24  }
  0x85   : > { %s3236_s14 = scalar_lea.hbm %s4048_s15, 2048 }
  0x86   : > { %p3237_p5 = scmp.ne.s32.totalorder %s4048_s15, %s3236_s14  ;;  %p3243_p3 = scmp.lt.u32.totalorder %s3236_s14, %s4048_s15 }
  0x88   : > { %p3239_p10 = pnand %p3237_p5, %p3517_p0 }
  0x8a   : > { %p3240_p2 = pneg %p3239_p10 }
  0x8c   : > { %p3245_p4 = pnand %p3243_p3, %p3240_p2 }
  0x8e   : > { %3248 = shalt.err (!%p3245_p4)
}
  0x8f   : > { %s3249_s21 = scalar_lea.vmem %s499_s17, 2048  ;;  %p3257_p13 = scmp.lt.s32.totalorder %s499_s17, %s499_s17 }
  0x90   : > { %p3250_p7 = scmp.ne.s32.totalorder %s499_s17, %s3249_s21  ;;  %p3258_p1 = scmp.lt.s32.totalorder %s3249_s21, %s3249_s21 }
  0x92   : > { %p3252_p8 = pnand %p3250_p7, %p3517_p0  ;;  %p3259_p6 = por %p3258_p1, %p3257_p13 }
  0x94   : > { %p3253_p11 = pneg %p3252_p8 }
  0x96   : > { %p3260_p9 = pnand %p3259_p6, %p3253_p11 }
  0x98   : > { %3263 = shalt.err (!%p3260_p9)
}
  0x99   : > { %s3349_s29 = smov 128   ;;  %s3350_s24 = smov 8  }
  0x9a   : > { %2974 = dma.hbm_to_vmem [thread:$0]  (!%p3501_p12), %s4048_s15, 2048, %s499_s17, [#allocation9], %s3349_s29, %s3349_s29, %s3350_s24  }
  0x9b   : > { %p4084_p5 = scmp.ne.s32.totalorder %s4079_s18, 0 }
  0x9c   : > { %p4085_p10 = scmp.eq.s32.totalorder (!%p4084_p5), %s3463_s25, 0 }
  0x9d   : > { %522 = sbr.rel (%p4084_p5) target bundleno = 1815 (0x717), region = 84 }
  0xa4   : > { %3309 = dma.done.wait (%p4085_p10), [#allocation3], 3072   ;;  %p4086_p0 = pmov %p4085_p10 }
  0xa6   : > { %3311 = vsyncadd (%p4086_p0), [#allocation3], 4294964224  ;;  %p4087_p2 = pmov %p4086_p0 }
  0xa7   : > { %p4088_p3 = pmov %p4086_p0 }
  0xa8   : > { %3313 = dma.done.wait (%p4087_p2), [#allocation6], 3584  }
  0xa9   : > { %3315 = vsyncadd (%p4088_p3), [#allocation6], 4294963712  ;;  %p4089_p4 = pmov %p4086_p0 }
  0xaa   : > { %p4090_p12 = pmov %p4086_p0 }
  0xab   : > { %3317 = dma.done.wait (%p4089_p4), [#allocation9], 4096  }
  0xac   : > { %3319 = vsyncadd (%p4090_p12), [#allocation9], 4294963200  ;;  %p588_p7 = scmp.lt.s32.totalorder %s3463_s25, 1  ;;  %v594_v0 = vlaneseq  ;;  %v3351_v1 = vmov 0.0   ;;  %vm3352_vm0 = vmmov 0   ;;  %s4091_s23 = sld [smem:[#allocation24_spill]] }
  0xad   : > { %2649 = vmatprep.subr.bf16.mxu0 %v3351_v1  ;;  %2651 = vmatprep.mubr.msk.bf16.mxu0 %vm3352_vm0, %v3351_v1  ;;  %v2432_v11 = vld [vmem:[%s4034_s1] ss:$0 sm:$0xff]  ;;  %vm636_vm5 = vcmask 130048   ;;  %v3039_v27 = vld [vmem:[#allocation2 + $0x48] sm:$0xff]   ;;  %v3040_v28 = vld [vmem:[#allocation2 + $0x50] sm:$0xff]   ;;  %vm1616_vm6 = vcmask 523264  }
  0xae   : > { %s589_s16 = scalar_select %p588_p7, %s3463_s25, 1  ;;  %v595_v2 = vshrl.u32 %v594_v0, 7  ;;  %2655 = vmatprep.subr.bf16.mxu1 %v3351_v1  ;;  %2657 = vmatprep.mubr.msk.bf16.mxu1 %vm3352_vm0, %v3351_v1  ;;  %v598_v4 = vand.u32 127, %v594_v0  ;;  %v2433_v14 = vld [vmem:[%s4035_s2] ss:$0 sm:$0xff]  ;;  %v3041_v29 = vld [vmem:[#allocation2 + $0x58] sm:$0xff]  }
  0xaf   : > { %v3038_v26 = vld [vmem:[#allocation2 + $0x40] sm:$0xff]   ;;  %v3043_v31 = vld [vmem:[#allocation2 + $0x68] sm:$0xff]   ;;  %v3044_v32 = vld [vmem:[#allocation2 + $0x70] sm:$0xff]   ;;  %s4092_s13 = sld [smem:[#allocation27_spill]]  ;;  %s4093_s14 = sld [smem:[#allocation28_spill]] }
  0xb0   : > { %s2566_s18 = sshll.u32 %s589_s16, 4  ;;  %v596_v3 = vadd.s32 8, %v595_v2  ;;  %v2430_v5 = vadd.s32 4294967295, %v595_v2  ;;  %v606_v6 = vadd.s32 1, %v595_v2  ;;  %v3042_v30 = vld [vmem:[#allocation2 + $0x60] sm:$0xff]   ;;  %v3045_v33 = vld [vmem:[#allocation2 + $0x78] sm:$0xff]  }
  0xb1   : > { %v3046_v34 = vld [vmem:[#allocation2] sm:$0xff]   ;;  %v3047_v35 = vld [vmem:[#allocation2 + $0x8] sm:$0xff]   ;;  %v3048_v36 = vld [vmem:[#allocation2 + $0x10] sm:$0xff]   ;;  %s4094_s0 = sld [smem:[#allocation17_spill]]  ;;  %s4095_s21 = sld [smem:[#allocation22_spill]] }
  0xb2   : > { %s3641_s27 = scalar_lea.vmem %s4091_s23, %s2566_s18  ;;  %v2431_v7 = vadd.s32 4294967295, %v596_v3  ;;  %v607_v8 = vadd.s32 1, %v596_v3  ;;  %vm601_vm1 = vcmp.eq.s32.totalorder %v598_v4, %v2430_v5  ;;  %vm608_vm2 = vcmp.eq.s32.totalorder %v598_v4, %v606_v6  ;;  %v3049_v37 = vld [vmem:[#allocation2 + $0x18] sm:$0xff]   ;;  %v3050_v38 = vld [vmem:[#allocation2 + $0x20] sm:$0xff]   ;;  %v3051_v39 = vld [vmem:[#allocation2 + $0x28] sm:$0xff]   ;;  %s2567_s29 = sshll.u32 %s3463_s25, 9 }
  0xb3   : > { %v613_v9 = vld [vmem:[%s3641_s27] sm:$0xff]  ;;  %v614_v10 = vld [vmem:[%s3641_s27 + $0x8] sm:$0xff]  ;;  %v603_v17 = vsel %vm601_vm1, 1.0, %v3351_v1  ;;  %v610_v18 = vsel %vm608_vm2, 1.0, %v3351_v1  ;;  %v3052_v40 = vld [vmem:[#allocation2 + $0x30] sm:$0xff]   ;;  %s4096_s20 = sld [smem:[#allocation29_spill]] }
  0xb4   : > { %v622_v12 = vmul.f32 %v2432_v11, %v613_v9  ;;  %v623_v13 = vmul.f32 %v2432_v11, %v614_v10  ;;  %vm602_vm3 = vcmp.eq.s32.totalorder %v598_v4, %v2431_v7  ;;  %vm609_vm4 = vcmp.eq.s32.totalorder %v598_v4, %v607_v8  ;;  %v3053_v41 = vld [vmem:[#allocation2 + $0x38] sm:$0xff]   ;;  %v3054_v47 = vld [vmem:[#allocation2 + $0x80] sm:$0xff]   ;;  %v3055_v53 = vld [vmem:[#allocation2 + $0x88] sm:$0xff]   ;;  %s3354_s26 = smov [#allocation11]  }
  0xb5   : > { %v604_v21 = vsel %vm602_vm3, 1.0, %v3351_v1  ;;  %v611_v22 = vsel %vm609_vm4, 1.0, %v3351_v1  ;;  %v3056_v54 = vld [vmem:[#allocation2 + $0x90] sm:$0xff]   ;;  %v3057_v55 = vld [vmem:[#allocation2 + $0x98] sm:$0xff]   ;;  %v3058_v56 = vld [vmem:[#allocation2 + $0xa0] sm:$0xff]   ;;  %s3268_s17 = sshll.u32 %s3354_s26, 4  ;;  %s3269_s17 = int_to_ptr.vmem [resolvable:$false] %s3268_s17 }
  0xb6   : > { %v631_v15 = vadd.f32 %v2433_v14, %v622_v12  ;;  %v632_v16 = vadd.f32 %v2433_v14, %v623_v13  ;;  %v3655_v24 = vpack.c.bf16 %v604_v21, %v603_v17  ;;  %v3657_v25 = vpack.c.bf16 %v611_v22, %v610_v18  ;;  %v3059_v57 = vld [vmem:[#allocation2 + $0xa8] sm:$0xff]   ;;  %v3060_v58 = vld [vmem:[#allocation2 + $0xb0] sm:$0xff]   ;;  %v3061_v59 = vld [vmem:[#allocation2 + $0xb8] sm:$0xff]   ;;  %s3270_s23 = scalar_lea.vmem %s3269_s17, 1024 }
  0xb7   : > { %v2460_v60 = vld [vmem:[%s4038_s5] ss:$0 sm:$0xff]  ;;  %v3063_v11 = vld [vmem:[%s4040_s7 + $0x48] sm:$0xff]   ;;  %v3064_v12 = vld [vmem:[%s4040_s7 + $0x50] sm:$0xff]   ;;  %p4097_p11 = scmp.ne.s32.totalorder %s4095_s21, 0 }
  0xb8   : > { %v633_v19 = vmax.f32 %v631_v15, 0.0  ;;  %v634_v20 = vmax.f32 %v632_v16, 0.0  ;;  %v2461_v62 = vld [vmem:[%s4039_s6] ss:$0 sm:$0xff]  ;;  %v3065_v13 = vld [vmem:[%s4040_s7 + $0x58] sm:$0xff]   ;;  %v3067_v15 = vld [vmem:[%s4040_s7 + $0x68] sm:$0xff]  }
  0xb9   : > { %v3062_v10 = vld [vmem:[%s4040_s7 + $0x40] sm:$0xff]   ;;  %v3068_v16 = vld [vmem:[%s4040_s7 + $0x70] sm:$0xff]   ;;  %v3069_v17 = vld [vmem:[%s4040_s7 + $0x78] sm:$0xff]   ;;  %s3990_s16 = scalar_lea.hbm %s4096_s20, %s2567_s29 }
  0xba   : > { %v635_v23 = vpack.c.bf16 %v634_v20, %v633_v19  ;;  %v3066_v14 = vld [vmem:[%s4040_s7 + $0x60] sm:$0xff]   ;;  %v3071_v19 = vld [vmem:[%s4040_s7 + $0x8] sm:$0xff]   ;;  %v3072_v20 = vld [vmem:[%s4040_s7 + $0x10] sm:$0xff]  }
  0xbb   : > { %v3070_v18 = vld [vmem:[%s4040_s7] sm:$0xff]   ;;  %v3073_v21 = vld [vmem:[%s4040_s7 + $0x18] sm:$0xff]  }
  0xbc   : > { %2650 = vmatpush3.bf16.msra.mxu0 %v635_v23  ;;  %2656 = vmatpush3.bf16.msra.mxu1 %v635_v23  ;;  %v3074_v22 = vld [vmem:[%s4040_s7 + $0x20] sm:$0xff]  }
  0xbd   : > { %2661 = vmatprep.subr.bf16.mxu0 %v3351_v1  ;;  %2721 = vmatprep.subr.bf16.mxu1 %v3351_v1 }
  0xbf   : > { %2652 = vmatmul.mubr.msk.bf16.vlgmr.msra.gmra.mrb[0].mxu0 %vm636_vm5, %v3655_v24  ;;  %2658 = vmatmul.mubr.msk.bf16.vlgmr.msra.gmra.mrb[0].mxu1 %vm636_vm5, %v3657_v25 }
  0xc0   : > { %2662 = vmatpush3.bf16.msra.mxu0 %v3038_v26  ;;  %2677 = vmatprep.mubr.msk.bf16.mxu0 %vm3352_vm0, %v3351_v1  ;;  %v3076_v26 = vld [vmem:[%s4040_s7 + $0x30] sm:$0xff]  }
  0xc1   : > { %2663 = vmatprep.subr.bf16.mxu0 %v3351_v1  ;;  %2723 = vmatprep.mubr.msk.bf16.mxu1 %vm3352_vm0, %v3351_v1 }
  0xc4   : > { %2664 = vmatpush3.bf16.msra.mxu0 %v3039_v27  ;;  %v3077_v27 = vld [vmem:[%s4040_s7 + $0x38] sm:$0xff]  }
  0xc5   : > { %2665 = vmatprep.subr.bf16.mxu0 %v3351_v1 }
  0xc8   : > { %2666 = vmatpush3.bf16.msra.mxu0 %v3040_v28 }
  0xc9   : > { %2667 = vmatprep.subr.bf16.mxu0 %v3351_v1 }
  0xcc   : > { %2668 = vmatpush3.bf16.msra.mxu0 %v3041_v29 }
  0xcd   : > { %2669 = vmatprep.subr.bf16.mxu0 %v3351_v1 }
  0xd0   : > { %2670 = vmatpush3.bf16.msra.mxu0 %v3042_v30 }
  0xd1   : > { %2671 = vmatprep.subr.bf16.mxu0 %v3351_v1 }
  0xd4   : > { %2672 = vmatpush3.bf16.msra.mxu0 %v3043_v31  ;;  %v3078_v31 = vld [vmem:[%s4040_s7 + $0x80] sm:$0xff]  }
  0xd5   : > { %2673 = vmatprep.subr.bf16.mxu0 %v3351_v1 }
  0xd8   : > { %2674 = vmatpush3.bf16.msra.mxu0 %v3044_v32 }
  0xd9   : > { %2675 = vmatprep.subr.bf16.mxu0 %v3351_v1 }
  0xdc   : > { %2676 = vmatpush3.bf16.msra.mxu0 %v3045_v33 }
  0xdd   : > { %2681 = vmatprep.subr.bf16.mxu0 %v3351_v1 }
  0xdf   : > { %2678 = vmatmul.mubr.bf16.vlgmr.msra.gmra.mrb[4].mxu0 %v635_v23  ;;  %v3075_v23 = vld [vmem:[%s4040_s7 + $0x28] sm:$0xff]  }
  0xe0   : > { %2682 = vmatpush3.bf16.msra.mxu0 %v3046_v34  ;;  %2697 = vmatprep.mubr.msk.bf16.mxu0 %vm3352_vm0, %v3351_v1  ;;  %v3079_v34 = vld [vmem:[%s4040_s7 + $0x88] sm:$0xff]  }
  0xe1   : > { %2683 = vmatprep.subr.bf16.mxu0 %v3351_v1 }
  0xe4   : > { %2684 = vmatpush3.bf16.msra.mxu0 %v3047_v35 }
  0xe5   : > { %2685 = vmatprep.subr.bf16.mxu0 %v3351_v1 }
  0xe8   : > { %2686 = vmatpush3.bf16.msra.mxu0 %v3048_v36 }
  0xe9   : > { %2687 = vmatprep.subr.bf16.mxu0 %v3351_v1 }
  0xec   : > { %2688 = vmatpush3.bf16.msra.mxu0 %v3049_v37  ;;  %v3080_v37 = vld [vmem:[%s4040_s7 + $0x90] sm:$0xff]  }
  0xed   : > { %2689 = vmatprep.subr.bf16.mxu0 %v3351_v1 }
  0xf0   : > { %2690 = vmatpush3.bf16.msra.mxu0 %v3050_v38 }
  0xf1   : > { %2691 = vmatprep.subr.bf16.mxu0 %v3351_v1 }
  0xf4   : > { %2692 = vmatpush3.bf16.msra.mxu0 %v3051_v39 }
  0xf5   : > { %2693 = vmatprep.subr.bf16.mxu0 %v3351_v1 }
  0xf8   : > { %2694 = vmatpush3.bf16.msra.mxu0 %v3052_v40 }
  0xf9   : > { %2695 = vmatprep.subr.bf16.mxu0 %v3351_v1 }
  0xfc   : > { %2696 = vmatpush3.bf16.msra.mxu0 %v3053_v41  ;;  %v3081_v41 = vld [vmem:[%s4040_s7 + $0x98] sm:$0xff]  }
  0xfd   : > { %2701 = vmatprep.subr.bf16.mxu0 %v3351_v1 }
 0x192   : > { %v674_v42 = vpop.f32.mrb[0].mxu0  ;;  %v719_v43 = vpop.f32.mrb[0].mxu1 }
 0x193   : > { %v2653_v44 = vpop.f32.mrb[1].mxu0  ;;  %v2659_v45 = vpop.f32.mrb[1].mxu1 }
 0x194   : > { %v677_v46 = vpop.f32.mrb[2].mxu0  ;;  %v722_v48 = vpop.f32.mrb[2].mxu1  ;;  %v3084_v44 = vld [vmem:[%s4040_s7 + $0xb0] sm:$0xff]   ;;  %v3085_v45 = vld [vmem:[%s4040_s7 + $0xb8] sm:$0xff]  }
 0x195   : > { %v681_v49 = vpack.c.bf16 %v677_v46, %v674_v42  ;;  %v2654_v50 = vpop.f32.mrb[3].mxu0  ;;  %v726_v51 = vpack.c.bf16 %v722_v48, %v719_v43  ;;  %v2660_v52 = vpop.f32.mrb[3].mxu1  ;;  %v3082_v42 = vld [vmem:[%s4040_s7 + $0xa0] sm:$0xff]   ;;  %v3083_v43 = vld [vmem:[%s4040_s7 + $0xa8] sm:$0xff]  }
 0x196   : > { %v2520_v46 = vld [vmem:[%s4042_s9] ss:$0 sm:$0xff] }
 0x197   : > { %2698 = vmatmul.mubr.bf16.vlgmr.msra.gmra.mrb[4].mxu0 %v681_v49  ;;  %v2521_v48 = vld [vmem:[%s4043_s10] ss:$0 sm:$0xff] }
 0x198   : > { %2702 = vmatpush3.bf16.msra.mxu0 %v3054_v47  ;;  %2717 = vmatprep.mubr.msk.bf16.mxu0 %vm3352_vm0, %v3351_v1 }
 0x199   : > { %2703 = vmatprep.subr.bf16.mxu0 %v3351_v1 }
 0x19c   : > { %2704 = vmatpush3.bf16.msra.mxu0 %v3055_v53 }
 0x19d   : > { %2705 = vmatprep.subr.bf16.mxu0 %v3351_v1 }
 0x1a0   : > { %2706 = vmatpush3.bf16.msra.mxu0 %v3056_v54 }
 0x1a1   : > { %2707 = vmatprep.subr.bf16.mxu0 %v3351_v1 }
 0x1a4   : > { %2708 = vmatpush3.bf16.msra.mxu0 %v3057_v55 }
 0x1a5   : > { %2709 = vmatprep.subr.bf16.mxu0 %v3351_v1 }
 0x1a8   : > { %2710 = vmatpush3.bf16.msra.mxu0 %v3058_v56  ;;  %v1841_v56 = vld [vmem:[#allocation5 + $0x8] sm:$0xff] }
 0x1a9   : > { %2711 = vmatprep.subr.bf16.mxu0 %v3351_v1 }
 0x1ac   : > { %2712 = vmatpush3.bf16.msra.mxu0 %v3059_v57  ;;  %v1843_v57 = vld [vmem:[#allocation5 + $0x18] sm:$0xff] }
 0x1ad   : > { %2713 = vmatprep.subr.bf16.mxu0 %v3351_v1 }
 0x1b0   : > { %2714 = vmatpush3.bf16.msra.mxu0 %v3060_v58 }
 0x1b1   : > { %2715 = vmatprep.subr.bf16.mxu0 %v3351_v1 }
 0x1b4   : > { %2716 = vmatpush3.bf16.msra.mxu0 %v3061_v59 }
 0x1b5   : > { %2799 = vmatprep.subr.bf16.mxu0 %v3351_v1 }
 0x1b7   : > { %2718 = vmatmul.mubr.bf16.vlgmr.msra.gmra.mrb[4].mxu0 %v726_v51 }
 0x1b8   : > { %2801 = vmatprep.mubr.msk.bf16.mxu0 %vm3352_vm0, %v3351_v1 }
 0x28a   : > { %v3702_v61 = vpop.f32.mrb[4].mxu0 }
 0x28b   : > { %v1053_v63 = vmul.f32 %v2460_v60, %v3702_v61  ;;  %v2719_v0 = vpop.f32.mrb[5].mxu0 }
 0x28c   : > { %v3708_v2 = vpop.f32.mrb[6].mxu0 }
 0x28d   : > { %v1062_v3 = vadd.f32 %v2461_v62, %v1053_v63  ;;  %v1054_v4 = vmul.f32 %v2460_v60, %v3708_v2  ;;  %v2720_v5 = vpop.f32.mrb[7].mxu0  ;;  %v2841_v60 = vpack.c.bf16 %v1843_v57, %v1841_v56  ;;  %v1842_v63 = vld [vmem:[#allocation5 + $0x10] sm:$0xff]  ;;  %v1824_v56 = vld [vmem:[%s4037_s4 + $0x80] sm:$0xff] }
 0x28e   : > { %v3086_v5 = vld [vmem:[#allocation7 + $0x20] sm:$0xff]   ;;  %v1826_v57 = vld [vmem:[%s4037_s4 + $0x90] sm:$0xff] }
 0x28f   : > { %v1063_v6 = vadd.f32 %v2461_v62, %v1054_v4  ;;  %v1064_v7 = vmax.f32 %v1062_v3, 0.0  ;;  %v1840_v62 = vld [vmem:[#allocation5] sm:$0xff]  ;;  %v1845_v3 = vld [vmem:[#allocation5 + $0x28] sm:$0xff]  ;;  %v1847_v4 = vld [vmem:[#allocation5 + $0x38] sm:$0xff] }
 0x291   : > { %v1065_v8 = vmax.f32 %v1063_v6, 0.0  ;;  %v2843_v6 = vpack.c.bf16 %v1842_v63, %v1840_v62  ;;  %v1828_v63 = vld [vmem:[%s4037_s4 + $0xa0] sm:$0xff] }
 0x293   : > { %v1066_v9 = vpack.c.bf16 %v1065_v8, %v1064_v7  ;;  %v2845_v7 = vpack.c.bf16 %v1847_v4, %v1845_v3  ;;  %v1844_v8 = vld [vmem:[#allocation5 + $0x20] sm:$0xff]  ;;  %v1833_v3 = vld [vmem:[%s4037_s4 + $0xc8] sm:$0xff]  ;;  %v1835_v4 = vld [vmem:[%s4037_s4 + $0xd8] sm:$0xff] }
 0x295   : > { %2722 = vmatpush3.bf16.msra.mxu1 %v1066_v9 }
 0x296   : > { %2727 = vmatprep.subr.bf16.mxu1 %v3351_v1 }
 0x298   : > { %2724 = vmatmul.mubr.msk.bf16.vlgmr.msra.gmra.mrb[4].mxu1 %vm636_vm5, %v3655_v24 }
 0x299   : > { %2728 = vmatpush3.bf16.msra.mxu1 %v1066_v9  ;;  %2729 = vmatprep.mubr.msk.bf16.mxu1 %vm3352_vm0, %v3351_v1 }
 0x29a   : > { %2733 = vmatprep.subr.bf16.mxu1 %v3351_v1 }
 0x2a0   : > { %2730 = vmatmul.mubr.msk.bf16.vlgmr.msra.gmra.mrb[8].mxu1 %vm636_vm5, %v3657_v25 }
 0x2a1   : > { %2734 = vmatpush3.bf16.msra.mxu1 %v3062_v10  ;;  %2749 = vmatprep.mubr.msk.bf16.mxu1 %vm3352_vm0, %v3351_v1  ;;  %v1849_v10 = vld [vmem:[#allocation5 + $0x48] sm:$0xff] }
 0x2a2   : > { %2735 = vmatprep.subr.bf16.mxu1 %v3351_v1 }
 0x2a5   : > { %2736 = vmatpush3.bf16.msra.mxu1 %v3063_v11  ;;  %v1851_v11 = vld [vmem:[#allocation5 + $0x58] sm:$0xff] }
 0x2a6   : > { %2737 = vmatprep.subr.bf16.mxu1 %v3351_v1 }
 0x2a9   : > { %2738 = vmatpush3.bf16.msra.mxu1 %v3064_v12  ;;  %v3087_v12 = vld [vmem:[#allocation7 + $0x28] sm:$0xff]  }
 0x2aa   : > { %2739 = vmatprep.subr.bf16.mxu1 %v3351_v1 }
 0x2ad   : > { %2740 = vmatpush3.bf16.msra.mxu1 %v3065_v13 }
 0x2ae   : > { %2741 = vmatprep.subr.bf16.mxu1 %v3351_v1 }
 0x2b1   : > { %2742 = vmatpush3.bf16.msra.mxu1 %v3066_v14  ;;  %v2849_v14 = vpack.c.bf16 %v1851_v11, %v1849_v10  ;;  %v1839_v10 = vld [vmem:[%s4037_s4 + $0xf8] sm:$0xff] }
 0x2b2   : > { %2743 = vmatprep.subr.bf16.mxu1 %v3351_v1 }
 0x2b5   : > { %2744 = vmatpush3.bf16.msra.mxu1 %v3067_v15  ;;  %v1848_v15 = vld [vmem:[#allocation5 + $0x40] sm:$0xff] }
 0x2b6   : > { %2745 = vmatprep.subr.bf16.mxu1 %v3351_v1 }
 0x2b9   : > { %2746 = vmatpush3.bf16.msra.mxu1 %v3068_v16  ;;  %v1850_v16 = vld [vmem:[#allocation5 + $0x50] sm:$0xff] }
 0x2ba   : > { %2747 = vmatprep.subr.bf16.mxu1 %v3351_v1 }
 0x2bd   : > { %2748 = vmatpush3.bf16.msra.mxu1 %v3069_v17  ;;  %v1853_v17 = vld [vmem:[#allocation5 + $0x68] sm:$0xff] }
 0x2be   : > { %2753 = vmatprep.subr.bf16.mxu1 %v3351_v1 }
 0x2c0   : > { %2750 = vmatmul.mubr.bf16.vlgmr.msra.gmra.mrb[12].mxu1 %v1066_v9  ;;  %v1846_v9 = vld [vmem:[#allocation5 + $0x30] sm:$0xff] }
 0x2c1   : > { %2754 = vmatpush3.bf16.msra.mxu1 %v3070_v18  ;;  %2769 = vmatprep.mubr.msk.bf16.mxu1 %vm3352_vm0, %v3351_v1  ;;  %v2847_v13 = vpack.c.bf16 %v1846_v9, %v1844_v8  ;;  %v1855_v18 = vld [vmem:[#allocation5 + $0x78] sm:$0xff]  ;;  %v1834_v8 = vld [vmem:[%s4037_s4 + $0xd0] sm:$0xff]  ;;  %v1837_v9 = vld [vmem:[%s4037_s4 + $0xe8] sm:$0xff] }
 0x2c2   : > { %2755 = vmatprep.subr.bf16.mxu1 %v3351_v1 }
 0x2c5   : > { %2756 = vmatpush3.bf16.msra.mxu1 %v3071_v19  ;;  %v2853_v19 = vpack.c.bf16 %v1855_v18, %v1853_v17  ;;  %v2017_v17 = vld [vmem:[#allocation8 + $0x8] sm:$0xff]  ;;  %v2019_v18 = vld [vmem:[#allocation8 + $0x18] sm:$0xff] }
 0x2c6   : > { %2757 = vmatprep.subr.bf16.mxu1 %v3351_v1 }
 0x2c9   : > { %2758 = vmatpush3.bf16.msra.mxu1 %v3072_v20  ;;  %v1852_v20 = vld [vmem:[#allocation5 + $0x60] sm:$0xff] }
 0x2ca   : > { %2759 = vmatprep.subr.bf16.mxu1 %v3351_v1 }
 0x2cd   : > { %2760 = vmatpush3.bf16.msra.mxu1 %v3073_v21  ;;  %v1854_v21 = vld [vmem:[#allocation5 + $0x70] sm:$0xff] }
 0x2ce   : > { %2761 = vmatprep.subr.bf16.mxu1 %v3351_v1 }
 0x2d1   : > { %2762 = vmatpush3.bf16.msra.mxu1 %v3074_v22  ;;  %v1809_v22 = vld [vmem:[%s4037_s4 + $0x8] sm:$0xff] }
 0x2d2   : > { %2763 = vmatprep.subr.bf16.mxu1 %v3351_v1 }
 0x2d5   : > { %2764 = vmatpush3.bf16.msra.mxu1 %v3075_v23  ;;  %v1811_v23 = vld [vmem:[%s4037_s4 + $0x18] sm:$0xff] }
 0x2d6   : > { %2765 = vmatprep.subr.bf16.mxu1 %v3351_v1 }
 0x2d9   : > { %2766 = vmatpush3.bf16.msra.mxu1 %v3076_v26  ;;  %v3089_v26 = vld [vmem:[#allocation7 + $0x38] sm:$0xff]  }
 0x2da   : > { %2767 = vmatprep.subr.bf16.mxu1 %v3351_v1 }
 0x2dd   : > { %2768 = vmatpush3.bf16.msra.mxu1 %v3077_v27  ;;  %v2855_v27 = vpack.c.bf16 %v1854_v21, %v1852_v20  ;;  %v2021_v21 = vld [vmem:[#allocation8 + $0x28] sm:$0xff] }
 0x2de   : > { %2773 = vmatprep.subr.bf16.mxu1 %v3351_v1 }
 0x36b   : > { %v1101_v28 = vpop.f32.mrb[4].mxu1 }
 0x36c   : > { %v2725_v29 = vpop.f32.mrb[5].mxu1 }
 0x36d   : > { %v1104_v30 = vpop.f32.mrb[6].mxu1  ;;  %v1808_v29 = vld [vmem:[%s4037_s4] sm:$0xff] }
 0x36e   : > { %v1108_v32 = vpack.c.bf16 %v1104_v30, %v1101_v28  ;;  %v2726_v33 = vpop.f32.mrb[7].mxu1  ;;  %v2857_v28 = vpack.c.bf16 %v1811_v23, %v1809_v22  ;;  %v1810_v30 = vld [vmem:[%s4037_s4 + $0x10] sm:$0xff]  ;;  %v2020_v23 = vld [vmem:[#allocation8 + $0x20] sm:$0xff] }
 0x36f   : > { %v2859_v33 = vpack.c.bf16 %v1810_v30, %v1808_v29  ;;  %v2024_v30 = vld [vmem:[#allocation8 + $0x40] sm:$0xff] }
 0x370   : > { %2770 = vmatmul.mubr.bf16.vlgmr.msra.gmra.mrb[12].mxu1 %v1108_v32  ;;  %v1815_v32 = vld [vmem:[%s4037_s4 + $0x38] sm:$0xff] }
 0x371   : > { %2774 = vmatpush3.bf16.msra.mxu1 %v3078_v31  ;;  %2789 = vmatprep.mubr.msk.bf16.mxu1 %vm3352_vm0, %v3351_v1  ;;  %v1813_v31 = vld [vmem:[%s4037_s4 + $0x28] sm:$0xff] }
 0x372   : > { %2775 = vmatprep.subr.bf16.mxu1 %v3351_v1 }
 0x373   : > { %v1143_v35 = vpop.f32.mrb[8].mxu1 }
 0x374   : > { %v2731_v36 = vpop.f32.mrb[9].mxu1 }
 0x375   : > { %2776 = vmatpush3.bf16.msra.mxu1 %v3079_v34  ;;  %v1146_v38 = vpop.f32.mrb[10].mxu1  ;;  %v2861_v34 = vpack.c.bf16 %v1815_v32, %v1813_v31  ;;  %v1814_v36 = vld [vmem:[%s4037_s4 + $0x30] sm:$0xff] }
 0x376   : > { %2777 = vmatprep.subr.bf16.mxu1 %v3351_v1  ;;  %v1150_v39 = vpack.c.bf16 %v1146_v38, %v1143_v35  ;;  %v2732_v40 = vpop.f32.mrb[11].mxu1  ;;  %v1812_v35 = vld [vmem:[%s4037_s4 + $0x20] sm:$0xff]  ;;  %v1817_v38 = vld [vmem:[%s4037_s4 + $0x48] sm:$0xff]  ;;  %v2026_v31 = vld [vmem:[#allocation8 + $0x50] sm:$0xff] }
 0x377   : > { %v2863_v40 = vpack.c.bf16 %v1814_v36, %v1812_v35  ;;  %v2899_v32 = vpack.c.bf16 %v2026_v31, %v2024_v30  ;;  %v2028_v36 = vld [vmem:[#allocation8 + $0x60] sm:$0xff] }
 0x379   : > { %2778 = vmatpush3.bf16.msra.mxu1 %v3080_v37  ;;  %v3090_v37 = vld [vmem:[#allocation7] sm:$0xff]  }
 0x37a   : > { %2779 = vmatprep.subr.bf16.mxu1 %v3351_v1 }
 0x37d   : > { %2780 = vmatpush3.bf16.msra.mxu1 %v3081_v41 }
 0x37e   : > { %2781 = vmatprep.subr.bf16.mxu1 %v3351_v1 }
 0x381   : > { %2782 = vmatpush3.bf16.msra.mxu1 %v3082_v42  ;;  %v1816_v42 = vld [vmem:[%s4037_s4 + $0x40] sm:$0xff] }
 0x382   : > { %2783 = vmatprep.subr.bf16.mxu1 %v3351_v1 }
 0x385   : > { %2784 = vmatpush3.bf16.msra.mxu1 %v3083_v43  ;;  %v1818_v43 = vld [vmem:[%s4037_s4 + $0x50] sm:$0xff] }
 0x386   : > { %2785 = vmatprep.subr.bf16.mxu1 %v3351_v1 }
 0x389   : > { %2786 = vmatpush3.bf16.msra.mxu1 %v3084_v44  ;;  %v3091_v44 = vld [vmem:[#allocation7 + $0x8] sm:$0xff]  }
 0x38a   : > { %2787 = vmatprep.subr.bf16.mxu1 %v3351_v1 }
 0x38d   : > { %2788 = vmatpush3.bf16.msra.mxu1 %v3085_v45  ;;  %v1821_v45 = vld [vmem:[%s4037_s4 + $0x68] sm:$0xff] }
 0x38e   : > { %2793 = vmatprep.subr.bf16.mxu1 %v3351_v1 }
 0x390   : > { %2790 = vmatmul.mubr.bf16.vlgmr.msra.gmra.mrb[12].mxu1 %v1150_v39  ;;  %v1819_v39 = vld [vmem:[%s4037_s4 + $0x58] sm:$0xff] }
 0x391   : > { %2795 = vmatprep.mubr.msk.bf16.mxu1 %vm3352_vm0, %v3351_v1  ;;  %v2865_v41 = vpack.c.bf16 %v1819_v39, %v1817_v38 }
 0x463   : > { %v3826_v47 = vpop.f32.mrb[12].mxu1 }
 0x464   : > { %v1477_v49 = vmul.f32 %v2520_v46, %v3826_v47  ;;  %v2791_v50 = vpop.f32.mrb[13].mxu1 }
 0x465   : > { %v3832_v51 = vpop.f32.mrb[14].mxu1  ;;  %v1822_v50 = vld [vmem:[%s4037_s4 + $0x70] sm:$0xff] }
 0x466   : > { %v1486_v52 = vadd.f32 %v2521_v48, %v1477_v49  ;;  %v1478_v53 = vmul.f32 %v2520_v46, %v3832_v51  ;;  %v2792_v54 = vpop.f32.mrb[15].mxu1  ;;  %v1823_v46 = vld [vmem:[%s4037_s4 + $0x78] sm:$0xff]  ;;  %v1820_v49 = vld [vmem:[%s4037_s4 + $0x60] sm:$0xff] }
 0x467   : > { %v2871_v54 = vpack.c.bf16 %v1822_v50, %v1820_v49  ;;  %v3095_v50 = vld [vmem:[#allocation7 + $0x48] sm:$0xff]  }
 0x468   : > { %v1487_v55 = vadd.f32 %v2521_v48, %v1478_v53  ;;  %v1488_v58 = vmax.f32 %v1486_v52, 0.0  ;;  %v2869_v48 = vpack.c.bf16 %v1823_v46, %v1821_v45  ;;  %v3092_v52 = vld [vmem:[#allocation7 + $0x10] sm:$0xff]   ;;  %v1827_v53 = vld [vmem:[%s4037_s4 + $0x98] sm:$0xff] }
 0x46a   : > { %v1489_v59 = vmax.f32 %v1487_v55, 0.0 }
 0x46c   : > { %v3835_v0 = vpack.c.bf16 %v1489_v59, %v1488_v58  ;;  %v1829_v58 = vld [vmem:[%s4037_s4 + $0xa8] sm:$0xff]  ;;  %v1831_v59 = vld [vmem:[%s4037_s4 + $0xb8] sm:$0xff] }
 0x46d   : > { %v2877_v62 = vpack.c.bf16 %v1831_v59, %v1829_v58  ;;  %v3104_v58 = vld [vmem:[#allocation10 + $0x20] ss:$8 sps:$4 sm:$0xff]   ;;  %v3109_v59 = vld [vmem:[#allocation10 + $0x34] ss:$8 sps:$4 sm:$0xff]  }
 0x46e   : > { %2794 = vmatpush3.bf16.msra.mxu1 %v3835_v0  ;;  %2800 = vmatpush3.bf16.msra.mxu0 %v3835_v0 }
 0x46f   : > { %2805 = vmatprep.subr.bf16.mxu0 %v3351_v1  ;;  %2842 = vmatprep.subr.bf16.mxu1 %v2841_v60  ;;  %v2875_v60 = vpack.c.bf16 %v1826_v57, %v1824_v56  ;;  %v3101_v56 = vld [vmem:[#allocation10 + $0x10] ss:$8 sps:$4 sm:$0xff]   ;;  %v3106_v57 = vld [vmem:[#allocation10 + $0x24] ss:$8 sps:$4 sm:$0xff]  }
 0x471   : > { %2796 = vmatmul.mubr.msk.bf16.vlgmr.msra.gmra.mrb[16].mxu1 %vm636_vm5, %v3655_v24  ;;  %2802 = vmatmul.mubr.msk.bf16.vlgmr.msra.gmra.mrb[8].mxu0 %vm636_vm5, %v3657_v25  ;;  %v3088_v24 = vld [vmem:[#allocation7 + $0x30] sm:$0xff]   ;;  %v2851_v25 = vpack.c.bf16 %v1850_v16, %v1848_v15  ;;  %v3093_v16 = vld [vmem:[#allocation7 + $0x18] sm:$0xff]  }
 0x472   : > { %2806 = vmatpush3.bf16.msra.mxu0 %v3086_v5  ;;  %2844 = vmatpush1.bf16.msra.mxu1 %v2843_v6  ;;  %v2881_v6 = vpack.c.bf16 %v1835_v4, %v1833_v3  ;;  %v3113_v3 = vld [vmem:[#allocation10 + $0x50] ss:$8 sps:$4 sm:$0xff]   ;;  %v3118_v4 = vld [vmem:[#allocation10 + $0x64] ss:$8 sps:$4 sm:$0xff]  }
 0x473   : > { %2807 = vmatprep.subr.bf16.mxu0 %v3351_v1  ;;  %2846 = vmatprep.subr.bf16.mxu1 %v2845_v7  ;;  %v1832_v7 = vld [vmem:[%s4037_s4 + $0xc0] sm:$0xff] }
 0x474   : > { %2813 = vmatprep.mubr.msk.bf16.mxu0 %vm3352_vm0, %v3351_v1  ;;  %1926 = vmatprep.mubr.f32.mxu1 %v3351_v1  ;;  %v2883_v11 = vpack.c.bf16 %v1834_v8, %v1832_v7  ;;  %v3119_v7 = vld [vmem:[#allocation10 + $0x70] ss:$8 sps:$4 sm:$0xff]   ;;  %v2543_v8 = vld [vmem:[%s4092_s13] ss:$0 sm:$0xff] }
 0x476   : > { %2808 = vmatpush3.bf16.msra.mxu0 %v3087_v12  ;;  %2848 = vmatpush1.bf16.msra.mxu1 %v2847_v13  ;;  %v2885_v12 = vpack.c.bf16 %v1839_v10, %v1837_v9  ;;  %v1836_v13 = vld [vmem:[%s4037_s4 + $0xe0] sm:$0xff] }
 0x477   : > { %2809 = vmatprep.subr.bf16.mxu0 %v3351_v1  ;;  %2850 = vmatprep.subr.bf16.mxu1 %v2849_v14  ;;  %v1838_v14 = vld [vmem:[%s4037_s4 + $0xf0] sm:$0xff]  ;;  %v3122_v9 = vld [vmem:[%s3641_s27] sm:$0xff] }
 0x478   : > { %v2887_v15 = vpack.c.bf16 %v1838_v14, %v1836_v13  ;;  %v2126_v10 = vmul.f32 %v3122_v9, %v2543_v8  ;;  %v2544_v13 = vld [vmem:[%s4093_s14] ss:$0 sm:$0xff] }
 0x47a   : > { %2810 = vmatpush3.bf16.msra.mxu0 %v3088_v24  ;;  %2852 = vmatpush1.bf16.msra.mxu1 %v2851_v25  ;;  %v2889_v24 = vpack.c.bf16 %v2019_v18, %v2017_v17  ;;  %v2016_v25 = vld [vmem:[#allocation8] sm:$0xff]  ;;  %v2135_v14 = vadd.f32 %v2544_v13, %v2126_v10 }
 0x47b   : > { %2811 = vmatprep.subr.bf16.mxu0 %v3351_v1  ;;  %2854 = vmatprep.subr.bf16.mxu1 %v2853_v19  ;;  %v2018_v19 = vld [vmem:[#allocation8 + $0x10] sm:$0xff] }
 0x47c   : > { %v2891_v20 = vpack.c.bf16 %v2018_v19, %v2016_v25 }
 0x47e   : > { %2812 = vmatpush3.bf16.msra.mxu0 %v3089_v26  ;;  %2856 = vmatpush1.bf16.msra.mxu1 %v2855_v27  ;;  %v2022_v26 = vld [vmem:[#allocation8 + $0x30] sm:$0xff]  ;;  %v2025_v27 = vld [vmem:[#allocation8 + $0x48] sm:$0xff] }
 0x47f   : > { %2858 = vmatprep.subr.bf16.mxu1 %v2857_v28  ;;  %2817 = vmatprep.subr.bf16.mxu0 %v3351_v1  ;;  %v2027_v28 = vld [vmem:[#allocation8 + $0x58] sm:$0xff] }
 0x480   : > { %v2897_v29 = vpack.c.bf16 %v2027_v28, %v2025_v27 }
 0x481   : > { %2814 = vmatmul.mubr.msk.bf16.vlgmr.msra.gmra.mrb[12].mxu0 %vm1616_vm6, %v3835_v0  ;;  %2539 = vmatmul.mubr.msk.f32.vlgmr.msra.gmra.mrb[20].mxu1 %vm1616_vm6, %v3826_v47  ;;  %v2867_v47 = vpack.c.bf16 %v1818_v43, %v1816_v42  ;;  %v1830_v0 = vld [vmem:[%s4037_s4 + $0xb0] sm:$0xff] }
 0x482   : > { %2860 = vmatpush1.bf16.msra.mxu1 %v2859_v33  ;;  %1932 = vmatprep.mubr.f32.mxu1 %v3351_v1  ;;  %v2879_v5 = vpack.c.bf16 %v1830_v0, %v1828_v63  ;;  %v2029_v33 = vld [vmem:[#allocation8 + $0x68] sm:$0xff]  ;;  %v3115_v0 = vld [vmem:[#allocation10 + $0x54] ss:$8 sps:$4 sm:$0xff]  }
 0x483   : > { %2862 = vmatprep.subr.bf16.mxu1 %v2861_v34  ;;  %2818 = vmatpush3.bf16.msra.mxu0 %v3090_v37  ;;  %v2031_v34 = vld [vmem:[#allocation8 + $0x78] sm:$0xff]  ;;  %v2030_v37 = vld [vmem:[#allocation8 + $0x70] sm:$0xff]  ;;  %v3110_v63 = vld [vmem:[#allocation10 + $0x40] ss:$8 sps:$4 sm:$0xff]  }
 0x484   : > { %2819 = vmatprep.subr.bf16.mxu0 %v3351_v1  ;;  %2825 = vmatprep.mubr.msk.bf16.mxu0 %vm3352_vm0, %v3351_v1  ;;  %v2901_v35 = vpack.c.bf16 %v2031_v34, %v2029_v33  ;;  %v2903_v38 = vpack.c.bf16 %v2030_v37, %v2028_v36 }
 0x485   : > { %2540 = vmatmul.mubr.msk.f32.gmra.mrb[22].mxu1 %vm1616_vm6, %v3832_v51  ;;  %v1825_v51 = vld [vmem:[%s4037_s4 + $0x88] sm:$0xff] }
 0x486   : > { %2864 = vmatpush1.bf16.msra.mxu1 %v2863_v40  ;;  %2003 = vmatprep.mubr.f32.mxu1 %v3351_v1  ;;  %v2873_v55 = vpack.c.bf16 %v1827_v53, %v1825_v51  ;;  %v3097_v51 = vld [vmem:[#allocation7 + $0x58] sm:$0xff]   ;;  %v3100_v53 = vld [vmem:[#allocation10 + $0x4] ss:$8 sps:$4 sm:$0xff]  }
 0x487   : > { %2866 = vmatprep.subr.bf16.mxu1 %v2865_v41  ;;  %2820 = vmatpush3.bf16.msra.mxu0 %v3091_v44  ;;  %v3094_v44 = vld [vmem:[#allocation7 + $0x40] sm:$0xff]  }
 0x488   : > { %2821 = vmatprep.subr.bf16.mxu0 %v3351_v1 }
 0x48a   : > { %2868 = vmatpush1.bf16.msra.mxu1 %v2867_v47 }
 0x48b   : > { %2870 = vmatprep.subr.bf16.mxu1 %v2869_v48  ;;  %2822 = vmatpush3.bf16.msra.mxu0 %v3092_v52  ;;  %v3096_v52 = vld [vmem:[#allocation7 + $0x50] sm:$0xff]  }
 0x48c   : > { %2823 = vmatprep.subr.bf16.mxu0 %v3351_v1 }
 0x48e   : > { %2872 = vmatpush1.bf16.msra.mxu1 %v2871_v54  ;;  %v3098_v54 = vld [vmem:[#allocation10] ss:$8 sps:$4 sm:$0xff]  }
 0x48f   : > { %2874 = vmatprep.subr.bf16.mxu1 %v2873_v55  ;;  %2824 = vmatpush3.bf16.msra.mxu0 %v3093_v16  ;;  %v3103_v55 = vld [vmem:[#allocation10 + $0x14] ss:$8 sps:$4 sm:$0xff]   ;;  %v2137_v16 = vmax.f32 %v2135_v14, 0.0 }
 0x490   : > { %2829 = vmatprep.subr.bf16.mxu0 %v3351_v1 }
 0x492   : > { %2876 = vmatpush1.bf16.msra.mxu1 %v2875_v60  ;;  %v3107_v60 = vld [vmem:[#allocation10 + $0x30] ss:$8 sps:$4 sm:$0xff]  }
 0x493   : > { %2878 = vmatprep.subr.bf16.mxu1 %v2877_v62  ;;  %v3112_v62 = vld [vmem:[#allocation10 + $0x44] ss:$8 sps:$4 sm:$0xff]  }
 0x496   : > { %2880 = vmatpush1.bf16.msra.mxu1 %v2879_v5  ;;  %v3116_v5 = vld [vmem:[#allocation10 + $0x60] ss:$8 sps:$4 sm:$0xff]  }
 0x497   : > { %2882 = vmatprep.subr.bf16.mxu1 %v2881_v6  ;;  %v3121_v6 = vld [vmem:[#allocation10 + $0x74] ss:$8 sps:$4 sm:$0xff]  }
 0x49a   : > { %2884 = vmatpush1.bf16.msra.mxu1 %v2883_v11  ;;  %v3123_v11 = vld [vmem:[%s3641_s27 + $0x8] sm:$0xff]  ;;  %s585_s27 = sand.u32 1, %s4094_s0  }
 0x49b   : > { %2886 = vmatprep.subr.bf16.mxu1 %v2885_v12  ;;  %v2127_v12 = vmul.f32 %v3123_v11, %v2543_v8  ;;  %s2427_s19 = sshll.u32 %s585_s27, 5  ;;  %s3992_s18 = scalar_lea.sflag [#allocation4], %s585_s27 }
 0x49c   : > { %s587_s28 = scalar_lea.vmem [#allocation11], %s2427_s19 }
 0x49d   : > { %s2301_s30 = sshll.u32 %s587_s28, 4  ;;  %s3985_s30 = int_to_ptr.vmem [resolvable:$true] %s2301_s30 }
 0x49e   : > { %2888 = vmatpush1.bf16.msra.mxu1 %v2887_v15  ;;  %v2136_v15 = vadd.f32 %v2544_v13, %v2127_v12  ;;  %s3264_s25 = scalar_lea.vmem %s3985_s30, 512  ;;  %p3271_p6 = scmp.lt.s32.totalorder %s3985_s30, %s3269_s17 }
 0x49f   : > { %2890 = vmatprep.subr.bf16.mxu1 %v2889_v24  ;;  %v3353_v24 = vmov 0   ;;  %p3265_p8 = scmp.ne.s32.totalorder %s3985_s30, %s3264_s25  ;;  %p3272_p9 = scmp.lt.s32.totalorder %s3270_s23, %s3264_s25 }
 0x4a0   : > { %v2138_v17 = vmax.f32 %v2136_v15, 0.0 }
 0x4a1   : > { %2004 = vmatmul.mubr.f32.vlgmr.msra.gmra.mrb[20].mxu1 %v3702_v61  ;;  %v2023_v61 = vld [vmem:[#allocation8 + $0x38] sm:$0xff]  ;;  %p3266_p13 = pnand %p3265_p8, %p4097_p11  ;;  %p3273_p5 = por %p3272_p9, %p3271_p6 }
 0x4a2   : > { %2009 = vmatprep.mubr.f32.mxu1 %v3351_v1  ;;  %2892 = vmatpush1.bf16.msra.mxu1 %v2891_v20  ;;  %v2893_v22 = vpack.c.bf16 %v2023_v61, %v2021_v21  ;;  %v2139_v18 = vpack.c.bf16 %v2138_v17, %v2137_v16 }
 0x4a3   : > { %p3267_p1 = pneg %p3266_p13 }
 0x4a4   : > { %2894 = vmatprep.subr.bf16.mxu1 %v2893_v22 }
 0x4a5   : > { %2010 = vmatmul.mubr.f32.gmra.mrb[22].mxu1 %v3708_v2  ;;  %v2895_v2 = vpack.c.bf16 %v2022_v26, %v2020_v23  ;;  %p3274_p10 = pnand %p3273_p5, %p3267_p1 }
 0x4a6   : > { %2102 = vmatprep.mubr.f32.mxu1 %v3351_v1 }
 0x4a7   : > { %2896 = vmatpush1.bf16.msra.mxu1 %v2895_v2 }
 0x4a8   : > { %2898 = vmatprep.subr.bf16.mxu1 %v2897_v29 }
 0x4ab   : > { %2900 = vmatpush1.bf16.msra.mxu1 %v2899_v32 }
 0x4ac   : > { %2902 = vmatprep.subr.bf16.mxu1 %v2901_v35 }
 0x4af   : > { %2904 = vmatpush1.bf16.msra.mxu1 %v2903_v38 }
 0x544   : > { %v1525_v39 = vpop.f32.mrb[16].mxu1  ;;  %v1567_v40 = vpop.f32.mrb[8].mxu0 }
 0x545   : > { %v2797_v41 = vpop.f32.mrb[17].mxu1  ;;  %v2803_v42 = vpop.f32.mrb[9].mxu0 }
 0x546   : > { %v1528_v43 = vpop.f32.mrb[18].mxu1  ;;  %v1570_v45 = vpop.f32.mrb[10].mxu0 }
 0x547   : > { %v1532_v46 = vpack.c.bf16 %v1528_v43, %v1525_v39  ;;  %v2798_v47 = vpop.f32.mrb[19].mxu1  ;;  %v1574_v48 = vpack.c.bf16 %v1570_v45, %v1567_v40  ;;  %v2804_v49 = vpop.f32.mrb[11].mxu0 }
 0x549   : > { %2826 = vmatmul.mubr.msk.bf16.vlgmr.msra.gmra.mrb[12].mxu0 %vm1616_vm6, %v1532_v46 }
 0x54a   : > { %2830 = vmatpush3.bf16.msra.mxu0 %v3094_v44  ;;  %2837 = vmatprep.mubr.msk.bf16.mxu0 %vm3352_vm0, %v3351_v1 }
 0x54b   : > { %2831 = vmatprep.subr.bf16.mxu0 %v3351_v1 }
 0x54e   : > { %2832 = vmatpush3.bf16.msra.mxu0 %v3095_v50 }
 0x54f   : > { %2833 = vmatprep.subr.bf16.mxu0 %v3351_v1 }
 0x552   : > { %2834 = vmatpush3.bf16.msra.mxu0 %v3096_v52 }
 0x553   : > { %2835 = vmatprep.subr.bf16.mxu0 %v3351_v1 }
 0x556   : > { %2836 = vmatpush3.bf16.msra.mxu0 %v3097_v51 }
 0x557   : > { %2236 = vmatprep.subr.bf16.mxu0 %v3100_v53 }
 0x559   : > { %2838 = vmatmul.mubr.msk.bf16.vlgmr.msra.gmra.mrb[12].mxu0 %vm1616_vm6, %v1574_v48 }
 0x55a   : > { %2237 = vmatpush1.bf16.msra.mxu0 %v3098_v54  ;;  %2268 = vmatprep.mubr.bf16.mxu0 %v3353_v24 }
 0x55b   : > { %2238 = vmatprep.subr.bf16.mxu0 %v3103_v55 }
 0x55e   : > { %2239 = vmatpush1.bf16.msra.mxu0 %v3101_v56 }
 0x55f   : > { %2240 = vmatprep.subr.bf16.mxu0 %v3106_v57 }
 0x562   : > { %2241 = vmatpush1.bf16.msra.mxu0 %v3104_v58 }
 0x563   : > { %2242 = vmatprep.subr.bf16.mxu0 %v3109_v59 }
 0x566   : > { %2243 = vmatpush1.bf16.msra.mxu0 %v3107_v60 }
 0x567   : > { %2244 = vmatprep.subr.bf16.mxu0 %v3112_v62 }
 0x56a   : > { %2245 = vmatpush1.bf16.msra.mxu0 %v3110_v63 }
 0x56b   : > { %2246 = vmatprep.subr.bf16.mxu0 %v3115_v0 }
 0x56e   : > { %2247 = vmatpush1.bf16.msra.mxu0 %v3113_v3 }
 0x56f   : > { %2248 = vmatprep.subr.bf16.mxu0 %v3118_v4 }
 0x572   : > { %2249 = vmatpush1.bf16.msra.mxu0 %v3116_v5 }
 0x573   : > { %2250 = vmatprep.subr.bf16.mxu0 %v3121_v6 }
 0x576   : > { %2251 = vmatpush1.bf16.msra.mxu0 %v3119_v7 }
 0x579   : > { %2269 = vmatmul.mubr.bf16.vlgmr.msra.gmra.mrb[16].mxu0 %v2139_v18 }
 0x62c   : > { %v1799_v25 = vpop.f32.mrb[12].mxu0 }
 0x62d   : > { %v2839_v19 = vpop.f32.mrb[13].mxu0  ;;  %2541 = vmatmul.mubr.msk.f32.vlgmr.msra.gmra.mrb[20].mxu1 %vm1616_vm6, %v1799_v25 }
 0x62e   : > { %v1802_v20 = vpop.f32.mrb[14].mxu0  ;;  %2108 = vmatprep.mubr.f32.mxu1 %v3351_v1 }
 0x62f   : > { %v2840_v21 = vpop.f32.mrb[15].mxu0 }
 0x631   : > { %2542 = vmatmul.mubr.msk.f32.gmra.mrb[22].mxu1 %vm1616_vm6, %v1802_v20 }
 0x64c   : > { %v2270_v61 = vpop.f32.mrb[16].mxu0 }
 0x64d   : > { %v2272_v22 = vpop.f32.mrb[17].mxu0 }
 0x64e   : > { %v2274_v23 = vpop.f32.mrb[18].mxu0 }
 0x64f   : > { %v2276_v26 = vpop.f32.mrb[19].mxu0 }
 0x700   : > { %v2104_v2 = vpop.f32.mrb[20].mxu1 }
 0x701   : > { %v2279_v27 = vadd.f32 %v2270_v61, %v2104_v2  ;;  %v2106_v28 = vpop.f32.mrb[21].mxu1 }
 0x702   : > { %v2280_v29 = vadd.f32 %v2272_v22, %v2106_v28 }
 0x703   : > { %2283 = vst [vmem:[%s587_s28] sm:$0xff] %v2279_v27 }
 0x704   : > { %2284 = vst [vmem:[%s587_s28 + $0x8] sm:$0xff] %v2280_v29  ;;  %v2110_v1 = vpop.f32.mrb[22].mxu1 }
 0x705   : > { %v2281_v30 = vadd.f32 %v2274_v23, %v2110_v1  ;;  %v2112_v31 = vpop.f32.mrb[23].mxu1 }
 0x706   : > { %v2282_v32 = vadd.f32 %v2276_v26, %v2112_v31 }
 0x707   : > { %2285 = vst [vmem:[%s587_s28 + $0x10] sm:$0xff] %v2281_v30 }
 0x708   : > { %2286 = vst [vmem:[%s587_s28 + $0x18] sm:$0xff] %v2282_v32 }
 0x709   : > { %3277 = shalt.err (!%p3274_p10)
}
 0x70a   : > { %s3278_s13 = scalar_lea.hbm %s3990_s16, 512  ;;  %s3282_s14 = scalar_lea.hbm %s4096_s20, 1024 }
 0x70b   : > { %p3279_p0 = scmp.ne.s32.totalorder %s3990_s16, %s3278_s13  ;;  %p3283_p4 = scmp.lt.u32.totalorder %s3990_s16, %s4096_s20 }
 0x70c   : > { %p3284_p12 = scmp.lt.u32.totalorder %s3282_s14, %s3278_s13  ;;  %p3286_p8 = scmp.lt.u32.totalorder %s3278_s13, %s3990_s16 }
 0x70d   : > { %p3280_p2 = pnand %p3279_p0, %p4097_p11 }
 0x70e   : > { %p3285_p7 = por %p3284_p12, %p3283_p4 }
 0x70f   : > { %p3281_p3 = pneg %p3280_p2 }
 0x710   : > { %p3287_p13 = por %p3286_p8, %p3285_p7 }
 0x712   : > { %p3288_p1 = pnand %p3287_p13, %p3281_p3 }
 0x714   : > { %3291 = shalt.err (!%p3288_p1)
}
 0x715   : > { %s3355_s19 = smov 256   ;;  %s3356_s28 = smov 16  }
 0x716   : > { %2957 = dma.vmem_to_hbm [thread:$0]  (%p4097_p11), %s3985_s30, 512, %s3990_s16, %s3992_s18, %s3355_s19, %s3355_s19, %s3356_s28  }
 0x717 PF: > { %s4098_s29 = sld [smem:[#allocation19_spill]]  ;;  %s4099_s24 = sld [smem:[#allocation16_spill]] }
 0x718   : > { %s4100_s22 = sld [smem:[#allocation23_spill]] }
 0x71d   : > { %p2989_p6 = scmp.ge.s32.totalorder %s4098_s29, 2  ;;  %s2316_s25 = sand.u32 1, %s4099_s24  }
 0x71e   : > { %p4101_p9 = scmp.ne.s32.totalorder %s4100_s22, 0  ;;  %s2317_s26 = scalar_lea.sflag [#allocation4], %s2316_s25 }
 0x720   : > { %p2976_p5 = pnand %p2989_p6, %p4101_p9 }
 0x722   : > { %3321 = dma.done.wait (!%p2976_p5), %s2317_s26, 512  }
 0x723   : > { %3323 = vsyncadd (!%p2976_p5), %s2317_s26, 4294966784  ;;  %s4102_s24 = sld [smem:[#allocation20_spill]]  ;;  %s4103_s21 = sld [smem:[#allocation17_spill]] }
 0x724   : > { %s4104_s22 = sld [smem:[#allocation18_spill]]  ;;  %s4105_s23 = sld [smem:[#allocation21_spill]] }
 0x729   : > { %p29_p10 = scmp.ge.s32.totalorder %s4102_s24, 4  }
 0x72b   :  { %31 = sbr.rel (!%p29_p10) target bundleno = 13 (0xd), region = 146 }
 0x732   :  { %2322 = vsyncpa [#allocation3], 1 }
 0x733   :  { %2324 = vsyncpa [#allocation3 + $0x1], 1 }
 0x734   :  { %2325 = vsyncpa [#allocation6], 1 }
 0x735   :  { %2326 = vsyncpa [#allocation9], 1 }
 0x736   :  { %2327 = vsyncpa [#allocation4], 1 }
 0x737   :  { %2329 = vsyncpa [#allocation4 + $0x1], 1 }

</bundles_post_ra>
